<compile_context>
chip_gen: v7x
topology: tpu7x:2x2x1
jax: 0.10.0
libtpu: 0.0.40
codegen_flags: <defaults>
</compile_context>

<pallas_src>
import math
import functools

import jax
import jax.numpy as jnp
from jax.experimental import pallas as pl
from jax.experimental.pallas import tpu as pltpu

# Squeezed block-dim marker (None is the equivalent spelling on older jax).
_SQ = pl.Squeezed() if hasattr(pl, "Squeezed") else None


def _dit_block_kernel(
    x_ref, ada_ref,
    wqkv_ref, bqkv_ref,
    wproj_ref, bproj_ref,
    wfc1_ref, bfc1_ref,
    wfc2_ref, bfc2_ref,
    o_ref,
    *, num_heads: int, kv_tile: int, eps: float = 1e-6,
):
    f32 = jnp.float32
    x = x_ref[...]                       # (S, H) f32
    ada = ada_ref[...]                   # (6, H) f32 (precomputed adaLN chunks)
    S, H = x.shape
    nh = num_heads
    hd = H // nh
    cdt = wqkv_ref.dtype                 # matmul operand dtype (bf16)

    shift_msa, scale_msa, gate_msa = ada[0:1, :], ada[1:2, :], ada[2:3, :]
    shift_mlp, scale_mlp, gate_mlp = ada[3:4, :], ada[4:5, :], ada[5:6, :]

    def layernorm(v):                    # affine-free LN, f32 stats
        mu = jnp.mean(v, axis=-1, keepdims=True)
        var = jnp.mean((v - mu) * (v - mu), axis=-1, keepdims=True)
        return (v - mu) * jax.lax.rsqrt(var + eps)

    # ---- MSA branch ---------------------------------------------------------
    xm = layernorm(x) * (scale_msa + 1.0) + shift_msa            # (S, H) f32

    # One lane-dense QKV projection: (S,H) @ (H,3H), bias add on (S,3H).
    qkv = jnp.dot(xm.astype(cdt), wqkv_ref[...],
                  preferred_element_type=f32) + bqkv_ref[...]    # (S, 3H) f32

    # Head-major relayout via static lane slices stacked on a new leading dim.
    def heads(base):
        return jnp.stack(
            [qkv[:, base + h * hd: base + (h + 1) * hd] for h in range(nh)],
            axis=0)                                              # (nh, S, hd)

    scale_attn = 1.0 / math.sqrt(hd)
    q = (heads(0) * scale_attn).astype(cdt)      # scale folded into q once
    k = heads(H).astype(cdt)
    v = heads(2 * H).astype(cdt)

    # Flash-style online softmax over K/V tiles: never materialize (nh, S, S).
    n_kv = S // kv_tile
    m_i = jnp.full((nh, S, 1), -jnp.inf, dtype=f32)
    l_i = jnp.zeros((nh, S, 1), dtype=f32)
    acc = jnp.zeros((nh, S, hd), dtype=f32)
    for t in range(n_kv):                         # static unrolled K-tile loop
        kt = k[:, t * kv_tile:(t + 1) * kv_tile, :]              # (nh, Tk, hd)
        vt = v[:, t * kv_tile:(t + 1) * kv_tile, :]
        s = jnp.einsum("nqd,nkd->nqk", q, kt,
                       preferred_element_type=f32)               # (nh, S, Tk)
        m_new = jnp.maximum(m_i, jnp.max(s, axis=-1, keepdims=True))
        alpha = jnp.exp(m_i - m_new)
        p = jnp.exp(s - m_new)
        l_i = alpha * l_i + jnp.sum(p, axis=-1, keepdims=True)
        acc = alpha * acc + jnp.einsum("nqk,nkd->nqd", p.astype(cdt), vt,
                                       preferred_element_type=f32)
        m_i = m_new
    pv = acc * pl.reciprocal(l_i, approx=True)                   # (nh, S, hd)

    # Output projection: per-head lane-dense (S,hd)@(hd,H) accumulated into one
    # (S,H) buffer (equivalent to concat(heads) @ W_proj, without nh partials).
    attn = jnp.zeros((S, H), f32)
    for h in range(nh):
        attn = attn + jnp.dot(pv[h].astype(cdt), wproj_ref[h],
                              preferred_element_type=f32)
    attn = attn + bproj_ref[...]                                 # (S, H)

    x1 = x + gate_msa * attn                                     # gated residual

    # ---- MLP branch ---------------------------------------------------------
    xm2 = layernorm(x1) * (scale_mlp + 1.0) + shift_mlp          # (S, H) f32
    h1 = jnp.dot(xm2.astype(cdt), wfc1_ref[...],
                 preferred_element_type=f32) + bfc1_ref[...]     # (S, Hm) f32
    h1 = jax.nn.gelu(h1, approximate=True)                       # GELU(tanh), f32
    h2 = jnp.dot(h1.astype(cdt), wfc2_ref[...],
                 preferred_element_type=f32) + bfc2_ref[...]     # (S, H) f32

    o_ref[...] = x1 + gate_mlp * h2


def dit_block_forward(x, c, params, *, num_heads, kv_tile=256):
    B, S, H = x.shape
    nh = num_heads
    hd = H // nh
    Hm = params["w_fc1"].shape[1]

    # Hoisted adaLN modulation (plain XLA; result is a tiny (B, 6, H) tensor).
    silu_c = c * jax.nn.sigmoid(c)
    ada = (silu_c @ params["w_ada"] + params["b_ada"]).reshape(B, 6, H)
    ada = ada.astype(jnp.float32)

    # Weight prep (one-time, normally done at parameter-load time): bf16 for
    # the MXU; biases stay f32 (added to f32 accumulators).
    cdt = jnp.bfloat16
    w_qkv = params["w_qkv"].astype(cdt)                          # (H, 3H)
    b_qkv = params["b_qkv"].astype(jnp.float32)                  # (1, 3H)
    w_proj = params["w_proj"].reshape(nh, hd, H).astype(cdt)     # (nh, hd, H)
    b_proj = params["b_proj"].astype(jnp.float32)                # (1, H)
    w_fc1 = params["w_fc1"].astype(cdt)                          # (H, Hm)
    b_fc1 = params["b_fc1"].astype(jnp.float32)                  # (1, Hm)
    w_fc2 = params["w_fc2"].astype(cdt)                          # (Hm, H)
    b_fc2 = params["b_fc2"].astype(jnp.float32)                  # (1, H)

    # K/V tile: largest value <= kv_tile that divides S.
    tk = min(kv_tile, S)
    while S % tk:
        tk -= 1

    def _wspec(shape):                   # constant block across the grid
        nd = len(shape)
        return pl.BlockSpec(shape, lambda b, _nd=nd: (0,) * _nd)

    kernel = functools.partial(_dit_block_kernel, num_heads=nh, kv_tile=tk)

    return pl.pallas_call(
        kernel,
        out_shape=jax.ShapeDtypeStruct((B, S, H), jnp.float32),
        grid=(B,),
        in_specs=[
            pl.BlockSpec((_SQ, S, H), lambda b: (b, 0, 0)),      # x   -> (S, H)
            pl.BlockSpec((_SQ, 6, H), lambda b: (b, 0, 0)),      # ada -> (6, H)
            _wspec((H, 3 * H)), _wspec((1, 3 * H)),              # qkv
            _wspec((nh, hd, H)), _wspec((1, H)),                 # attn proj
            _wspec((H, Hm)), _wspec((1, Hm)),                    # mlp fc1
            _wspec((Hm, H)), _wspec((1, H)),                     # mlp fc2
        ],
        out_specs=pl.BlockSpec((_SQ, S, H), lambda b: (b, 0, 0)),
        compiler_params=pltpu.CompilerParams(
            dimension_semantics=("parallel",),   # batch axis across TCs
            vmem_limit_bytes=64 * 1024 * 1024,
        ),
    )(
        x, ada,
        w_qkv, b_qkv,
        w_proj, b_proj,
        w_fc1, b_fc1,
        w_fc2, b_fc2,
    )


# ----------------------------- pure-JAX reference ----------------------------
def dit_block_reference(x, c, params, *, num_heads, eps=1e-6):
    B, S, H = x.shape
    hd = H // num_heads

    def layernorm(v):
        mu = jnp.mean(v, axis=-1, keepdims=True)
        var = jnp.mean((v - mu) ** 2, axis=-1, keepdims=True)
        return (v - mu) / jnp.sqrt(var + eps)

    ada = jax.nn.silu(c) @ params["w_ada"] + params["b_ada"][0]
    shift_msa, scale_msa, gate_msa, shift_mlp, scale_mlp, gate_mlp = jnp.split(ada, 6, axis=1)

    xm = layernorm(x) * (scale_msa[:, None, :] + 1.0) + shift_msa[:, None, :]
    qkv = xm @ params["w_qkv"] + params["b_qkv"][0]
    q, k, v = jnp.split(qkv, 3, axis=-1)
    q = q.reshape(B, S, num_heads, hd).transpose(0, 2, 1, 3)
    k = k.reshape(B, S, num_heads, hd).transpose(0, 2, 1, 3)
    v = v.reshape(B, S, num_heads, hd).transpose(0, 2, 1, 3)
    s = jnp.einsum("bhqd,bhkd->bhqk", q, k) / math.sqrt(hd)
    p = jax.nn.softmax(s, axis=-1)
    attn = jnp.einsum("bhqk,bhkd->bhqd", p, v).transpose(0, 2, 1, 3).reshape(B, S, H)
    attn = attn @ params["w_proj"] + params["b_proj"][0]
    x1 = x + gate_msa[:, None, :] * attn

    xm2 = layernorm(x1) * (scale_mlp[:, None, :] + 1.0) + shift_mlp[:, None, :]
    h1 = jax.nn.gelu(xm2 @ params["w_fc1"] + params["b_fc1"][0], approximate=True)
    h2 = h1 @ params["w_fc2"] + params["b_fc2"][0]
    return x1 + gate_mlp[:, None, :] * h2


if __name__ == "__main__":
    B, S, H = 2, 8, 32
    num_heads = 4
    mlp_ratio = 4.0
    Hm = int(H * mlp_ratio)

    key = jax.random.PRNGKey(0)
    keys = jax.random.split(key, 12)

    def winit(k, shape, fan_in):
        return (jax.random.normal(k, shape, jnp.float32) / math.sqrt(fan_in)) * 0.5

    params = {
        "w_ada": winit(keys[0], (H, 6 * H), H),
        "b_ada": winit(keys[1], (1, 6 * H), H) * 0.1,
        "w_qkv": winit(keys[2], (H, 3 * H), H),
        "b_qkv": winit(keys[3], (1, 3 * H), H) * 0.1,
        "w_proj": winit(keys[4], (H, H), H),
        "b_proj": winit(keys[5], (1, H), H) * 0.1,
        "w_fc1": winit(keys[6], (H, Hm), H),
        "b_fc1": winit(keys[7], (1, Hm), H) * 0.1,
        "w_fc2": winit(keys[8], (Hm, H), Hm),
        "b_fc2": winit(keys[9], (1, H), Hm) * 0.1,
    }

    x = jax.random.normal(keys[10], (B, S, H), jnp.float32)
    c = jax.random.normal(keys[11], (B, H), jnp.float32)

    out = dit_block_forward(x, c, params, num_heads=num_heads)
    out = jax.block_until_ready(out)

    ref = dit_block_reference(x, c, params, num_heads=num_heads)
    assert out.shape == (B, S, H)
    # Tolerance accounts for bf16 matmul operands (f32 accumulation) and the
    # EUP approximate reciprocal in the softmax normalization.
    assert jnp.allclose(out, ref, atol=3e-2, rtol=3e-2), "mismatch vs JAX reference"

    print("KERNEL_OK")
</pallas_src>

<mosaic_0001>
module attributes {stable_mosaic.version = 11 : i64} {
  func.func @_dit_block_kernel(%arg0: i32, %arg1: memref<1x8x32xf32, #tpu.memory_space<vmem>>, %arg2: memref<1x6x32xf32, #tpu.memory_space<vmem>>, %arg3: memref<32x96xbf16, #tpu.memory_space<vmem>>, %arg4: memref<1x96xf32, #tpu.memory_space<vmem>>, %arg5: memref<4x8x32xbf16, #tpu.memory_space<vmem>>, %arg6: memref<1x32xf32, #tpu.memory_space<vmem>>, %arg7: memref<32x128xbf16, #tpu.memory_space<vmem>>, %arg8: memref<1x128xf32, #tpu.memory_space<vmem>>, %arg9: memref<128x32xbf16, #tpu.memory_space<vmem>>, %arg10: memref<1x32xf32, #tpu.memory_space<vmem>>, %arg11: memref<1x8x32xf32, #tpu.memory_space<vmem>>) attributes {dimension_semantics = [#tpu.dimension_semantics<parallel>], iteration_bounds = array<i64: 2>, scalar_prefetch = 0 : i64, scratch_operands = 0 : i64, tpu.core_type = #tpu.core_type<tc>, window_params = [{transform_indices = @transform_0, window_bounds = array<i64: 1, 8, 32>}, {transform_indices = @transform_1, window_bounds = array<i64: 1, 6, 32>}, {pipeline_mode = #tpu.pipeline_mode<synchronous>, transform_indices = @transform_2, window_bounds = array<i64: 32, 96>}, {pipeline_mode = #tpu.pipeline_mode<synchronous>, transform_indices = @transform_3, window_bounds = array<i64: 1, 96>}, {pipeline_mode = #tpu.pipeline_mode<synchronous>, transform_indices = @transform_4, window_bounds = array<i64: 4, 8, 32>}, {pipeline_mode = #tpu.pipeline_mode<synchronous>, transform_indices = @transform_5, window_bounds = array<i64: 1, 32>}, {pipeline_mode = #tpu.pipeline_mode<synchronous>, transform_indices = @transform_6, window_bounds = array<i64: 32, 128>}, {pipeline_mode = #tpu.pipeline_mode<synchronous>, transform_indices = @transform_7, window_bounds = array<i64: 1, 128>}, {pipeline_mode = #tpu.pipeline_mode<synchronous>, transform_indices = @transform_8, window_bounds = array<i64: 128, 32>}, {pipeline_mode = #tpu.pipeline_mode<synchronous>, transform_indices = @transform_9, window_bounds = array<i64: 1, 32>}, {transform_indices = @transform_10, window_bounds = array<i64: 1, 8, 32>}]} {
    %c0 = arith.constant 0 : index
    %c0_0 = arith.constant 0 : index
    %c0_1 = arith.constant 0 : index
    %0 = vector.load %arg1[%c0, %c0_0, %c0_1] : memref<1x8x32xf32, #tpu.memory_space<vmem>>, vector<1x8x32xf32>
    %1 = vector.shape_cast %0 : vector<1x8x32xf32> to vector<8x32xf32>
    %c0_2 = arith.constant 0 : index
    %c0_3 = arith.constant 0 : index
    %c0_4 = arith.constant 0 : index
    %2 = vector.load %arg2[%c0_2, %c0_3, %c0_4] : memref<1x6x32xf32, #tpu.memory_space<vmem>>, vector<1x6x32xf32>
    %3 = vector.shape_cast %2 : vector<1x6x32xf32> to vector<6x32xf32>
    %4 = vector.extract_strided_slice %3 {offsets = [0, 0], sizes = [1, 32], strides = [1, 1]} : vector<6x32xf32> to vector<1x32xf32>
    %5 = vector.extract_strided_slice %3 {offsets = [1, 0], sizes = [1, 32], strides = [1, 1]} : vector<6x32xf32> to vector<1x32xf32>
    %6 = vector.extract_strided_slice %3 {offsets = [2, 0], sizes = [1, 32], strides = [1, 1]} : vector<6x32xf32> to vector<1x32xf32>
    %7 = vector.extract_strided_slice %3 {offsets = [3, 0], sizes = [1, 32], strides = [1, 1]} : vector<6x32xf32> to vector<1x32xf32>
    %8 = vector.extract_strided_slice %3 {offsets = [4, 0], sizes = [1, 32], strides = [1, 1]} : vector<6x32xf32> to vector<1x32xf32>
    %9 = vector.extract_strided_slice %3 {offsets = [5, 0], sizes = [1, 32], strides = [1, 1]} : vector<6x32xf32> to vector<1x32xf32>
    %cst = arith.constant dense<0.000000e+00> : vector<8xf32>
    %10 = vector.multi_reduction <add>, %1, %cst [1] : vector<8x32xf32> to vector<8xf32>
    %11 = vector.shape_cast %10 : vector<8xf32> to vector<8x1xf32>
    %cst_5 = arith.constant 3.200000e+01 : f32
    %12 = vector.broadcast %cst_5 : f32 to vector<8x1xf32>
    %13 = arith.divf %11, %12 : vector<8x1xf32>
    %14 = vector.broadcast %13 : vector<8x1xf32> to vector<8x32xf32>
    %15 = arith.subf %1, %14 : vector<8x32xf32>
    %16 = vector.broadcast %13 : vector<8x1xf32> to vector<8x32xf32>
    %17 = arith.subf %1, %16 : vector<8x32xf32>
    %18 = arith.mulf %15, %17 : vector<8x32xf32>
    %cst_6 = arith.constant dense<0.000000e+00> : vector<8xf32>
    %19 = vector.multi_reduction <add>, %18, %cst_6 [1] : vector<8x32xf32> to vector<8xf32>
    %20 = vector.shape_cast %19 : vector<8xf32> to vector<8x1xf32>
    %cst_7 = arith.constant 3.200000e+01 : f32
    %21 = vector.broadcast %cst_7 : f32 to vector<8x1xf32>
    %22 = arith.divf %20, %21 : vector<8x1xf32>
    %23 = vector.broadcast %13 : vector<8x1xf32> to vector<8x32xf32>
    %24 = arith.subf %1, %23 : vector<8x32xf32>
    %cst_8 = arith.constant 9.99999997E-7 : f32
    %25 = vector.broadcast %cst_8 : f32 to vector<8x1xf32>
    %26 = arith.addf %22, %25 : vector<8x1xf32>
    %27 = math.rsqrt %26 : vector<8x1xf32>
    %28 = vector.broadcast %27 : vector<8x1xf32> to vector<8x32xf32>
    %29 = arith.mulf %24, %28 : vector<8x32xf32>
    %cst_9 = arith.constant 1.000000e+00 : f32
    %30 = vector.broadcast %cst_9 : f32 to vector<1x32xf32>
    %31 = arith.addf %5, %30 : vector<1x32xf32>
    %32 = vector.broadcast %31 : vector<1x32xf32> to vector<8x32xf32>
    %33 = arith.mulf %29, %32 : vector<8x32xf32>
    %34 = vector.broadcast %4 : vector<1x32xf32> to vector<8x32xf32>
    %35 = arith.addf %33, %34 : vector<8x32xf32>
    %36 = arith.truncf %35 : vector<8x32xf32> to vector<8x32xbf16>
    %c0_10 = arith.constant 0 : index
    %c0_11 = arith.constant 0 : index
    %37 = vector.load %arg3[%c0_10, %c0_11] : memref<32x96xbf16, #tpu.memory_space<vmem>>, vector<32x96xbf16>
    %cst_12 = arith.constant dense<0.000000e+00> : vector<8x96xf32>
    %38 = tpu.matmul %36, %37, %cst_12 {dimension_numbers = #tpu.dot_dimension_numbers<[1], [0], [0], [1], [0, 0, 1, 1], [], []>} : vector<8x32xbf16>, vector<32x96xbf16>, vector<8x96xf32> -> vector<8x96xf32>
    %c0_13 = arith.constant 0 : index
    %c0_14 = arith.constant 0 : index
    %39 = vector.load %arg4[%c0_13, %c0_14] : memref<1x96xf32, #tpu.memory_space<vmem>>, vector<1x96xf32>
    %40 = vector.broadcast %39 : vector<1x96xf32> to vector<8x96xf32>
    %41 = arith.addf %38, %40 : vector<8x96xf32>
    %42 = vector.extract_strided_slice %41 {offsets = [0, 0], sizes = [8, 8], strides = [1, 1]} : vector<8x96xf32> to vector<8x8xf32>
    %43 = vector.extract_strided_slice %41 {offsets = [0, 8], sizes = [8, 8], strides = [1, 1]} : vector<8x96xf32> to vector<8x8xf32>
    %44 = vector.extract_strided_slice %41 {offsets = [0, 16], sizes = [8, 8], strides = [1, 1]} : vector<8x96xf32> to vector<8x8xf32>
    %45 = vector.extract_strided_slice %41 {offsets = [0, 24], sizes = [8, 8], strides = [1, 1]} : vector<8x96xf32> to vector<8x8xf32>
    %46 = vector.shape_cast %42 : vector<8x8xf32> to vector<1x8x8xf32>
    %47 = vector.shape_cast %43 : vector<8x8xf32> to vector<1x8x8xf32>
    %48 = vector.shape_cast %44 : vector<8x8xf32> to vector<1x8x8xf32>
    %49 = vector.shape_cast %45 : vector<8x8xf32> to vector<1x8x8xf32>
    %50 = tpu.concatenate %46, %47, %48, %49 in 0 : vector<1x8x8xf32>, vector<1x8x8xf32>, vector<1x8x8xf32>, vector<1x8x8xf32> -> vector<4x8x8xf32>
    %cst_15 = arith.constant 0.353553385 : f32
    %51 = vector.broadcast %cst_15 : f32 to vector<4x8x8xf32>
    %52 = arith.mulf %50, %51 : vector<4x8x8xf32>
    %53 = arith.truncf %52 : vector<4x8x8xf32> to vector<4x8x8xbf16>
    %54 = vector.extract_strided_slice %41 {offsets = [0, 32], sizes = [8, 8], strides = [1, 1]} : vector<8x96xf32> to vector<8x8xf32>
    %55 = vector.extract_strided_slice %41 {offsets = [0, 40], sizes = [8, 8], strides = [1, 1]} : vector<8x96xf32> to vector<8x8xf32>
    %56 = vector.extract_strided_slice %41 {offsets = [0, 48], sizes = [8, 8], strides = [1, 1]} : vector<8x96xf32> to vector<8x8xf32>
    %57 = vector.extract_strided_slice %41 {offsets = [0, 56], sizes = [8, 8], strides = [1, 1]} : vector<8x96xf32> to vector<8x8xf32>
    %58 = vector.shape_cast %54 : vector<8x8xf32> to vector<1x8x8xf32>
    %59 = vector.shape_cast %55 : vector<8x8xf32> to vector<1x8x8xf32>
    %60 = vector.shape_cast %56 : vector<8x8xf32> to vector<1x8x8xf32>
    %61 = vector.shape_cast %57 : vector<8x8xf32> to vector<1x8x8xf32>
    %62 = tpu.concatenate %58, %59, %60, %61 in 0 : vector<1x8x8xf32>, vector<1x8x8xf32>, vector<1x8x8xf32>, vector<1x8x8xf32> -> vector<4x8x8xf32>
    %63 = arith.truncf %62 : vector<4x8x8xf32> to vector<4x8x8xbf16>
    %64 = vector.extract_strided_slice %41 {offsets = [0, 64], sizes = [8, 8], strides = [1, 1]} : vector<8x96xf32> to vector<8x8xf32>
    %65 = vector.extract_strided_slice %41 {offsets = [0, 72], sizes = [8, 8], strides = [1, 1]} : vector<8x96xf32> to vector<8x8xf32>
    %66 = vector.extract_strided_slice %41 {offsets = [0, 80], sizes = [8, 8], strides = [1, 1]} : vector<8x96xf32> to vector<8x8xf32>
    %67 = vector.extract_strided_slice %41 {offsets = [0, 88], sizes = [8, 8], strides = [1, 1]} : vector<8x96xf32> to vector<8x8xf32>
    %68 = vector.shape_cast %64 : vector<8x8xf32> to vector<1x8x8xf32>
    %69 = vector.shape_cast %65 : vector<8x8xf32> to vector<1x8x8xf32>
    %70 = vector.shape_cast %66 : vector<8x8xf32> to vector<1x8x8xf32>
    %71 = vector.shape_cast %67 : vector<8x8xf32> to vector<1x8x8xf32>
    %72 = tpu.concatenate %68, %69, %70, %71 in 0 : vector<1x8x8xf32>, vector<1x8x8xf32>, vector<1x8x8xf32>, vector<1x8x8xf32> -> vector<4x8x8xf32>
    %73 = arith.truncf %72 : vector<4x8x8xf32> to vector<4x8x8xbf16>
    %cst_16 = arith.constant 0xFF800000 : f32
    %74 = vector.broadcast %cst_16 : f32 to vector<4x8x1xf32>
    %cst_17 = arith.constant 0.000000e+00 : f32
    %75 = vector.broadcast %cst_17 : f32 to vector<4x8x1xf32>
    %cst_18 = arith.constant 0.000000e+00 : f32
    %76 = vector.broadcast %cst_18 : f32 to vector<4x8x8xf32>
    "tpu.trace_start"() <{level = 10 : i32, message = "nqd,nkd->nqk"}> : () -> ()
    %cst_19 = arith.constant dense<0.000000e+00> : vector<4x8x8xf32>
    %77 = tpu.matmul %53, %63, %cst_19 {dimension_numbers = #tpu.dot_dimension_numbers<[2], [2], [1], [1], [0, 0, 0, 1, 1, 1], [0], [0]>} : vector<4x8x8xbf16>, vector<4x8x8xbf16>, vector<4x8x8xf32> -> vector<4x8x8xf32>
    "tpu.trace_stop"() : () -> ()
    %cst_20 = arith.constant dense<0xFF800000> : vector<4x8xf32>
    %78 = vector.multi_reduction <maximumf>, %77, %cst_20 [2] : vector<4x8x8xf32> to vector<4x8xf32>
    %79 = vector.shape_cast %78 : vector<4x8xf32> to vector<4x8x1xf32>
    %80 = arith.maximumf %74, %79 : vector<4x8x1xf32>
    %81 = arith.subf %74, %80 : vector<4x8x1xf32>
    %82 = math.exp %81 : vector<4x8x1xf32>
    %83 = vector.broadcast %80 : vector<4x8x1xf32> to vector<4x8x8xf32>
    %84 = arith.subf %77, %83 : vector<4x8x8xf32>
    %85 = math.exp %84 : vector<4x8x8xf32>
    %86 = arith.mulf %82, %75 : vector<4x8x1xf32>
    %cst_21 = arith.constant dense<0.000000e+00> : vector<4x8xf32>
    %87 = vector.multi_reduction <add>, %85, %cst_21 [2] : vector<4x8x8xf32> to vector<4x8xf32>
    %88 = vector.shape_cast %87 : vector<4x8xf32> to vector<4x8x1xf32>
    %89 = arith.addf %86, %88 : vector<4x8x1xf32>
    %90 = vector.broadcast %82 : vector<4x8x1xf32> to vector<4x8x8xf32>
    %91 = arith.mulf %90, %76 : vector<4x8x8xf32>
    %92 = arith.truncf %85 : vector<4x8x8xf32> to vector<4x8x8xbf16>
    "tpu.trace_start"() <{level = 10 : i32, message = "nqk,nkd->nqd"}> : () -> ()
    %cst_22 = arith.constant dense<0.000000e+00> : vector<4x8x8xf32>
    %93 = tpu.matmul %92, %73, %cst_22 {dimension_numbers = #tpu.dot_dimension_numbers<[2], [1], [1], [2], [0, 0, 0, 1, 1, 2], [0], [0]>} : vector<4x8x8xbf16>, vector<4x8x8xbf16>, vector<4x8x8xf32> -> vector<4x8x8xf32>
    "tpu.trace_stop"() : () -> ()
    %94 = arith.addf %91, %93 : vector<4x8x8xf32>
    %95 = tpu.reciprocal %89 {approx = true} : vector<4x8x1xf32> -> vector<4x8x1xf32>
    %96 = vector.broadcast %95 : vector<4x8x1xf32> to vector<4x8x8xf32>
    %97 = arith.mulf %94, %96 : vector<4x8x8xf32>
    %cst_23 = arith.constant 0.000000e+00 : f32
    %98 = vector.broadcast %cst_23 : f32 to vector<8x32xf32>
    %99 = vector.extract_strided_slice %97 {offsets = [0, 0, 0], sizes = [1, 8, 8], strides = [1, 1, 1]} : vector<4x8x8xf32> to vector<1x8x8xf32>
    %100 = vector.shape_cast %99 : vector<1x8x8xf32> to vector<8x8xf32>
    %101 = arith.truncf %100 : vector<8x8xf32> to vector<8x8xbf16>
    %c0_24 = arith.constant 0 : index
    %c0_25 = arith.constant 0 : index
    %c0_26 = arith.constant 0 : index
    %102 = vector.load %arg5[%c0_24, %c0_25, %c0_26] : memref<4x8x32xbf16, #tpu.memory_space<vmem>>, vector<1x8x32xbf16>
    %103 = vector.shape_cast %102 : vector<1x8x32xbf16> to vector<8x32xbf16>
    %cst_27 = arith.constant dense<0.000000e+00> : vector<8x32xf32>
    %104 = tpu.matmul %101, %103, %cst_27 {dimension_numbers = #tpu.dot_dimension_numbers<[1], [0], [0], [1], [0, 0, 1, 1], [], []>} : vector<8x8xbf16>, vector<8x32xbf16>, vector<8x32xf32> -> vector<8x32xf32>
    %105 = arith.addf %98, %104 : vector<8x32xf32>
    %106 = vector.extract_strided_slice %97 {offsets = [1, 0, 0], sizes = [1, 8, 8], strides = [1, 1, 1]} : vector<4x8x8xf32> to vector<1x8x8xf32>
    %107 = vector.shape_cast %106 : vector<1x8x8xf32> to vector<8x8xf32>
    %108 = arith.truncf %107 : vector<8x8xf32> to vector<8x8xbf16>
    %c1 = arith.constant 1 : index
    %c0_28 = arith.constant 0 : index
    %c0_29 = arith.constant 0 : index
    %109 = vector.load %arg5[%c1, %c0_28, %c0_29] : memref<4x8x32xbf16, #tpu.memory_space<vmem>>, vector<1x8x32xbf16>
    %110 = vector.shape_cast %109 : vector<1x8x32xbf16> to vector<8x32xbf16>
    %cst_30 = arith.constant dense<0.000000e+00> : vector<8x32xf32>
    %111 = tpu.matmul %108, %110, %cst_30 {dimension_numbers = #tpu.dot_dimension_numbers<[1], [0], [0], [1], [0, 0, 1, 1], [], []>} : vector<8x8xbf16>, vector<8x32xbf16>, vector<8x32xf32> -> vector<8x32xf32>
    %112 = arith.addf %105, %111 : vector<8x32xf32>
    %113 = vector.extract_strided_slice %97 {offsets = [2, 0, 0], sizes = [1, 8, 8], strides = [1, 1, 1]} : vector<4x8x8xf32> to vector<1x8x8xf32>
    %114 = vector.shape_cast %113 : vector<1x8x8xf32> to vector<8x8xf32>
    %115 = arith.truncf %114 : vector<8x8xf32> to vector<8x8xbf16>
    %c2 = arith.constant 2 : index
    %c0_31 = arith.constant 0 : index
    %c0_32 = arith.constant 0 : index
    %116 = vector.load %arg5[%c2, %c0_31, %c0_32] : memref<4x8x32xbf16, #tpu.memory_space<vmem>>, vector<1x8x32xbf16>
    %117 = vector.shape_cast %116 : vector<1x8x32xbf16> to vector<8x32xbf16>
    %cst_33 = arith.constant dense<0.000000e+00> : vector<8x32xf32>
    %118 = tpu.matmul %115, %117, %cst_33 {dimension_numbers = #tpu.dot_dimension_numbers<[1], [0], [0], [1], [0, 0, 1, 1], [], []>} : vector<8x8xbf16>, vector<8x32xbf16>, vector<8x32xf32> -> vector<8x32xf32>
    %119 = arith.addf %112, %118 : vector<8x32xf32>
    %120 = vector.extract_strided_slice %97 {offsets = [3, 0, 0], sizes = [1, 8, 8], strides = [1, 1, 1]} : vector<4x8x8xf32> to vector<1x8x8xf32>
    %121 = vector.shape_cast %120 : vector<1x8x8xf32> to vector<8x8xf32>
    %122 = arith.truncf %121 : vector<8x8xf32> to vector<8x8xbf16>
    %c3 = arith.constant 3 : index
    %c0_34 = arith.constant 0 : index
    %c0_35 = arith.constant 0 : index
    %123 = vector.load %arg5[%c3, %c0_34, %c0_35] : memref<4x8x32xbf16, #tpu.memory_space<vmem>>, vector<1x8x32xbf16>
    %124 = vector.shape_cast %123 : vector<1x8x32xbf16> to vector<8x32xbf16>
    %cst_36 = arith.constant dense<0.000000e+00> : vector<8x32xf32>
    %125 = tpu.matmul %122, %124, %cst_36 {dimension_numbers = #tpu.dot_dimension_numbers<[1], [0], [0], [1], [0, 0, 1, 1], [], []>} : vector<8x8xbf16>, vector<8x32xbf16>, vector<8x32xf32> -> vector<8x32xf32>
    %126 = arith.addf %119, %125 : vector<8x32xf32>
    %c0_37 = arith.constant 0 : index
    %c0_38 = arith.constant 0 : index
    %127 = vector.load %arg6[%c0_37, %c0_38] : memref<1x32xf32, #tpu.memory_space<vmem>>, vector<1x32xf32>
    %128 = vector.broadcast %127 : vector<1x32xf32> to vector<8x32xf32>
    %129 = arith.addf %126, %128 : vector<8x32xf32>
    %130 = vector.broadcast %6 : vector<1x32xf32> to vector<8x32xf32>
    %131 = arith.mulf %130, %129 : vector<8x32xf32>
    %132 = arith.addf %1, %131 : vector<8x32xf32>
    %cst_39 = arith.constant dense<0.000000e+00> : vector<8xf32>
    %133 = vector.multi_reduction <add>, %132, %cst_39 [1] : vector<8x32xf32> to vector<8xf32>
    %134 = vector.shape_cast %133 : vector<8xf32> to vector<8x1xf32>
    %cst_40 = arith.constant 3.200000e+01 : f32
    %135 = vector.broadcast %cst_40 : f32 to vector<8x1xf32>
    %136 = arith.divf %134, %135 : vector<8x1xf32>
    %137 = vector.broadcast %136 : vector<8x1xf32> to vector<8x32xf32>
    %138 = arith.subf %132, %137 : vector<8x32xf32>
    %139 = vector.broadcast %136 : vector<8x1xf32> to vector<8x32xf32>
    %140 = arith.subf %132, %139 : vector<8x32xf32>
    %141 = arith.mulf %138, %140 : vector<8x32xf32>
    %cst_41 = arith.constant dense<0.000000e+00> : vector<8xf32>
    %142 = vector.multi_reduction <add>, %141, %cst_41 [1] : vector<8x32xf32> to vector<8xf32>
    %143 = vector.shape_cast %142 : vector<8xf32> to vector<8x1xf32>
    %cst_42 = arith.constant 3.200000e+01 : f32
    %144 = vector.broadcast %cst_42 : f32 to vector<8x1xf32>
    %145 = arith.divf %143, %144 : vector<8x1xf32>
    %146 = vector.broadcast %136 : vector<8x1xf32> to vector<8x32xf32>
    %147 = arith.subf %132, %146 : vector<8x32xf32>
    %cst_43 = arith.constant 9.99999997E-7 : f32
    %148 = vector.broadcast %cst_43 : f32 to vector<8x1xf32>
    %149 = arith.addf %145, %148 : vector<8x1xf32>
    %150 = math.rsqrt %149 : vector<8x1xf32>
    %151 = vector.broadcast %150 : vector<8x1xf32> to vector<8x32xf32>
    %152 = arith.mulf %147, %151 : vector<8x32xf32>
    %cst_44 = arith.constant 1.000000e+00 : f32
    %153 = vector.broadcast %cst_44 : f32 to vector<1x32xf32>
    %154 = arith.addf %8, %153 : vector<1x32xf32>
    %155 = vector.broadcast %154 : vector<1x32xf32> to vector<8x32xf32>
    %156 = arith.mulf %152, %155 : vector<8x32xf32>
    %157 = vector.broadcast %7 : vector<1x32xf32> to vector<8x32xf32>
    %158 = arith.addf %156, %157 : vector<8x32xf32>
    %159 = arith.truncf %158 : vector<8x32xf32> to vector<8x32xbf16>
    %c0_45 = arith.constant 0 : index
    %c0_46 = arith.constant 0 : index
    %160 = vector.load %arg7[%c0_45, %c0_46] : memref<32x128xbf16, #tpu.memory_space<vmem>>, vector<32x128xbf16>
    %cst_47 = arith.constant dense<0.000000e+00> : vector<8x128xf32>
    %161 = tpu.matmul %159, %160, %cst_47 {dimension_numbers = #tpu.dot_dimension_numbers<[1], [0], [0], [1], [0, 0, 1, 1], [], []>} : vector<8x32xbf16>, vector<32x128xbf16>, vector<8x128xf32> -> vector<8x128xf32>
    %c0_48 = arith.constant 0 : index
    %c0_49 = arith.constant 0 : index
    %162 = vector.load %arg8[%c0_48, %c0_49] : memref<1x128xf32, #tpu.memory_space<vmem>>, vector<1x128xf32>
    %163 = vector.broadcast %162 : vector<1x128xf32> to vector<8x128xf32>
    %164 = arith.addf %161, %163 : vector<8x128xf32>
    %165 = arith.mulf %164, %164 : vector<8x128xf32>
    %166 = arith.mulf %164, %165 : vector<8x128xf32>
    %cst_50 = arith.constant 4.471500e-02 : f32
    %167 = vector.broadcast %cst_50 : f32 to vector<8x128xf32>
    %168 = arith.mulf %167, %166 : vector<8x128xf32>
    %169 = arith.addf %164, %168 : vector<8x128xf32>
    %cst_51 = arith.constant 0.797884583 : f32
    %170 = vector.broadcast %cst_51 : f32 to vector<8x128xf32>
    %171 = arith.mulf %170, %169 : vector<8x128xf32>
    %172 = math.tanh %171 : vector<8x128xf32>
    %cst_52 = arith.constant 1.000000e+00 : f32
    %173 = vector.broadcast %cst_52 : f32 to vector<8x128xf32>
    %174 = arith.addf %173, %172 : vector<8x128xf32>
    %cst_53 = arith.constant 5.000000e-01 : f32
    %175 = vector.broadcast %cst_53 : f32 to vector<8x128xf32>
    %176 = arith.mulf %175, %174 : vector<8x128xf32>
    %177 = arith.mulf %164, %176 : vector<8x128xf32>
    %178 = arith.truncf %177 : vector<8x128xf32> to vector<8x128xbf16>
    %c0_54 = arith.constant 0 : index
    %c0_55 = arith.constant 0 : index
    %179 = vector.load %arg9[%c0_54, %c0_55] : memref<128x32xbf16, #tpu.memory_space<vmem>>, vector<128x32xbf16>
    %cst_56 = arith.constant dense<0.000000e+00> : vector<8x32xf32>
    %180 = tpu.matmul %178, %179, %cst_56 {dimension_numbers = #tpu.dot_dimension_numbers<[1], [0], [0], [1], [0, 0, 1, 1], [], []>} : vector<8x128xbf16>, vector<128x32xbf16>, vector<8x32xf32> -> vector<8x32xf32>
    %c0_57 = arith.constant 0 : index
    %c0_58 = arith.constant 0 : index
    %181 = vector.load %arg10[%c0_57, %c0_58] : memref<1x32xf32, #tpu.memory_space<vmem>>, vector<1x32xf32>
    %182 = vector.broadcast %181 : vector<1x32xf32> to vector<8x32xf32>
    %183 = arith.addf %180, %182 : vector<8x32xf32>
    %184 = vector.broadcast %9 : vector<1x32xf32> to vector<8x32xf32>
    %185 = arith.mulf %184, %183 : vector<8x32xf32>
    %186 = arith.addf %132, %185 : vector<8x32xf32>
    %c0_59 = arith.constant 0 : index
    %c0_60 = arith.constant 0 : index
    %c0_61 = arith.constant 0 : index
    %187 = vector.load %arg11[%c0_59, %c0_60, %c0_61] : memref<1x8x32xf32, #tpu.memory_space<vmem>>, vector<1x8x32xf32>
    %188 = vector.shape_cast %187 : vector<1x8x32xf32> to vector<8x32xf32>
    %189 = vector.shape_cast %186 : vector<8x32xf32> to vector<1x8x32xf32>
    tpu.vector_store %arg11[%c0_59, %c0_60, %c0_61], %189 {strides = array<i32>} : memref<1x8x32xf32, #tpu.memory_space<vmem>>, vector<1x8x32xf32>,
    return
  }
  func.func @transform_0(%arg0: i32) -> (i32, i32, i32) {
    %c0_i32 = arith.constant 0 : i32
    %c0_i32_0 = arith.constant 0 : i32
    %c0_i32_1 = arith.constant 0 : i32
    return %arg0, %c0_i32, %c0_i32_0 : i32, i32, i32
  }
  func.func @transform_1(%arg0: i32) -> (i32, i32, i32) {
    %c0_i32 = arith.constant 0 : i32
    %c0_i32_0 = arith.constant 0 : i32
    %c0_i32_1 = arith.constant 0 : i32
    return %arg0, %c0_i32, %c0_i32_0 : i32, i32, i32
  }
  func.func @transform_2(%arg0: i32) -> (i32, i32) {
    %c0_i32 = arith.constant 0 : i32
    %c0_i32_0 = arith.constant 0 : i32
    %c0_i32_1 = arith.constant 0 : i32
    return %c0_i32, %c0_i32_0 : i32, i32
  }
  func.func @transform_3(%arg0: i32) -> (i32, i32) {
    %c0_i32 = arith.constant 0 : i32
    %c0_i32_0 = arith.constant 0 : i32
    %c0_i32_1 = arith.constant 0 : i32
    return %c0_i32, %c0_i32_0 : i32, i32
  }
  func.func @transform_4(%arg0: i32) -> (i32, i32, i32) {
    %c0_i32 = arith.constant 0 : i32
    %c0_i32_0 = arith.constant 0 : i32
    %c0_i32_1 = arith.constant 0 : i32
    %c0_i32_2 = arith.constant 0 : i32
    return %c0_i32, %c0_i32_0, %c0_i32_1 : i32, i32, i32
  }
  func.func @transform_5(%arg0: i32) -> (i32, i32) {
    %c0_i32 = arith.constant 0 : i32
    %c0_i32_0 = arith.constant 0 : i32
    %c0_i32_1 = arith.constant 0 : i32
    return %c0_i32, %c0_i32_0 : i32, i32
  }
  func.func @transform_6(%arg0: i32) -> (i32, i32) {
    %c0_i32 = arith.constant 0 : i32
    %c0_i32_0 = arith.constant 0 : i32
    %c0_i32_1 = arith.constant 0 : i32
    return %c0_i32, %c0_i32_0 : i32, i32
  }
  func.func @transform_7(%arg0: i32) -> (i32, i32) {
    %c0_i32 = arith.constant 0 : i32
    %c0_i32_0 = arith.constant 0 : i32
    %c0_i32_1 = arith.constant 0 : i32
    return %c0_i32, %c0_i32_0 : i32, i32
  }
  func.func @transform_8(%arg0: i32) -> (i32, i32) {
    %c0_i32 = arith.constant 0 : i32
    %c0_i32_0 = arith.constant 0 : i32
    %c0_i32_1 = arith.constant 0 : i32
    return %c0_i32, %c0_i32_0 : i32, i32
  }
  func.func @transform_9(%arg0: i32) -> (i32, i32) {
    %c0_i32 = arith.constant 0 : i32
    %c0_i32_0 = arith.constant 0 : i32
    %c0_i32_1 = arith.constant 0 : i32
    return %c0_i32, %c0_i32_0 : i32, i32
  }
  func.func @transform_10(%arg0: i32) -> (i32, i32, i32) {
    %c0_i32 = arith.constant 0 : i32
    %c0_i32_0 = arith.constant 0 : i32
    %c0_i32_1 = arith.constant 0 : i32
    return %arg0, %c0_i32, %c0_i32_0 : i32, i32, i32
  }
}

</mosaic_0001>

<bundles_post_ra>
// kernel: tpu_custom_call.1
= control target key start
LH: loop header
LB: loop body
LE: loop exit
PB: predicated region body
PF: predicated region fallthrough
CT: control target
= control target key end

     0   :  { %s3121_s0 = inlined_call_operand.hbm [shape: f32[2,8,32], index: 0, kind: input, shape index: {}]   ;;  %s3122_s1 = inlined_call_operand.hbm [shape: f32[2,6,32], index: 1, kind: input, shape index: {}]   ;;  %s3123_s2 = inlined_call_operand.hbm [shape: bf16[32,96], index: 2, kind: input, shape index: {}]   ;;  %s3124_s3 = inlined_call_operand.hbm [shape: f32[1,96], index: 3, kind: input, shape index: {}]   ;;  %s3125_s4 = inlined_call_operand.hbm [shape: bf16[4,8,32], index: 4, kind: input, shape index: {}]   ;;  %s3126_s5 = inlined_call_operand.hbm [shape: f32[1,32], index: 5, kind: input, shape index: {}]   ;;  %s3127_s6 = inlined_call_operand.hbm [shape: bf16[32,128], index: 6, kind: input, shape index: {}]   ;;  %s3128_s7 = inlined_call_operand.hbm [shape: f32[1,128], index: 7, kind: input, shape index: {}]   ;;  %s3129_s8 = inlined_call_operand.hbm [shape: bf16[128,32], index: 8, kind: input, shape index: {}]   ;;  %s3130_s9 = inlined_call_operand.hbm [shape: f32[1,32], index: 9, kind: input, shape index: {}]   ;;  %s3131_s10 = inlined_call_operand.hbm [shape: f32[2,8,32], index: 10, kind: output, shape index: {}]  }
   0x1   :  { %3140 = sst [smem:[#allocation29_spill]] %s3123_s2 }
   0x2   :  { %3141 = sst [smem:[#allocation30_spill]] %s3124_s3 }
   0x3   :  { %3142 = sst [smem:[#allocation31_spill]] %s3125_s4 }
   0x4   :  { %3143 = sst [smem:[#allocation32_spill]] %s3126_s5 }
   0x5   :  { %3144 = sst [smem:[#allocation33_spill]] %s3127_s6 }
   0x6   :  { %3145 = sst [smem:[#allocation34_spill]] %s3131_s10 }
   0x7   :  { %15 = vsyncpa [#allocation3], 0 }
   0x8   :  { %17 = vsyncpa [#allocation3 + $0x1], 0 }
   0x9   :  { %18 = vsyncpa [#allocation6], 0 }
   0xa   :  { %20 = vsyncpa [#allocation6 + $0x1], 0 }
   0xb   :  { %21 = vsyncpa [#allocation9], 0 }
   0xc   :  { %22 = vsyncpa [#allocation12], 0 }
   0xd   :  { %23 = vsyncpa [#allocation15], 0 }
   0xe   :  { %24 = vsyncpa [#allocation18], 0 }
   0xf   :  { %25 = vsyncpa [#allocation4], 0 }
  0x10   :  { %27 = vsyncpa [#allocation4 + $0x1], 0  ;;  %s2554_s13 = smov 0   ;;  %s2556_s14 = smov 0  }
  0x11   :  { %s2558_s15 = smov 0   ;;  %s2560_s16 = smov 0  }
  0x12 LB: > { %s2479_s17 = smov [#allocation7]   ;;  %s2575_s19 = sadd.s32 4294967295, %s2477_s16   ;;  %s2477_s16 = sphi %s2560_s16, %s3182_s16   ;;  %s2473_s15 = sphi %s2558_s15, %s3181_s15   ;;  %s2469_s14 = sphi %s2556_s14, %s3180_s14   ;;  %s2465_s13 = sphi %s2554_s13, %s3179_s13  }
  0x13   : > { %s296_s18 = sshll.u32 %s2479_s17, 4  ;;  %p1713_p0 = scmp.ge.s32.totalorder %s2477_s16, 1  ;;  %s2580_s18 = int_to_ptr.vmem [resolvable:$true] %s296_s18 }
  0x14   : > { %p3136_p1 = scmp.eq.s32.totalorder %s2575_s19, 0  ;;  %p284_p2 = scmp.lt.s32.totalorder %s2477_s16, 3 }
  0x15   : > { %s2480_s21 = smov [#allocation8]   ;;  %s2481_s24 = smov [#allocation11]  }
  0x16   : > { %p2582_p3 = pnand %p1713_p0, %p284_p2  ;;  %s310_s22 = sshll.u32 %s2480_s21, 4  ;;  %s2595_s22 = int_to_ptr.vmem [resolvable:$true] %s310_s22 }
  0x17   : > { %s334_s25 = sshll.u32 %s2481_s24, 4  ;;  %s3149_s2 = sld [smem:[#allocation29_spill]]  ;;  %s2597_s25 = int_to_ptr.vmem [resolvable:$true] %s334_s25 }
  0x18   : > { %s3146_s20 = scalar_select %p2582_p3, 1, 0 }
  0x19   : > { %p1958_p5 = pneg %p2582_p3 }
  0x1a   : > { %3147 = sst [smem:[#allocation28_spill]] %s3146_s20 }
  0x1b   : > { %p2591_p6 = pnand %p1958_p5, %p3136_p1 }
  0x1d   : > { %s2103_s28 = scalar_lea.hbm %s3149_s2, 256  ;;  %p2607_p8 = pneg %p2591_p6 }
  0x1e   : > { %p2104_p7 = scmp.ne.s32.totalorder %s3149_s2, %s2103_s28  ;;  %p2110_p11 = scmp.lt.u32.totalorder %s2103_s28, %s3149_s2 }
  0x20   : > { %p2106_p9 = pnand %p2607_p8, %p2104_p7 }
  0x22   : > { %p2107_p10 = pneg %p2106_p9 }
  0x24   : > { %p2112_p12 = pnand %p2110_p11, %p2107_p10 }
  0x26   : > { %2115 = shalt.err (!%p2112_p12)
}
  0x27   : > { %s2116_s21 = scalar_lea.vmem %s2580_s18, 256  ;;  %p2124_p5 = scmp.lt.s32.totalorder %s2580_s18, %s2580_s18 }
  0x28   : > { %p2117_p13 = scmp.ne.s32.totalorder %s2580_s18, %s2116_s21  ;;  %p2125_p4 = scmp.lt.s32.totalorder %s2116_s21, %s2116_s21 }
  0x2a   : > { %p2119_p0 = pnand %p2117_p13, %p2607_p8  ;;  %p2126_p7 = por %p2125_p4, %p2124_p5 }
  0x2c   : > { %p2120_p2 = pneg %p2119_p0 }
  0x2e   : > { %p2127_p9 = pnand %p2126_p7, %p2120_p2 }
  0x30   : > { %2130 = shalt.err (!%p2127_p9)
}
  0x31   : > { %s3134_s24 = smov 64   ;;  %s2483_s26 = smov 4  }
  0x32   : > { %1961 = dma.hbm_to_vmem [thread:$0]  (!%p2591_p6), %s3149_s2, 256, %s2580_s18, [#allocation6], %s3134_s24, %s3134_s24, %s2483_s26  }
  0x33   : > { %s3151_s3 = sld [smem:[#allocation30_spill]] }
  0x39   : > { %s2131_s12 = scalar_lea.hbm %s3151_s3, 16 }
  0x3a   : > { %p2132_p4 = scmp.ne.s32.totalorder %s3151_s3, %s2131_s12  ;;  %p2138_p12 = scmp.lt.u32.totalorder %s2131_s12, %s3151_s3 }
  0x3c   : > { %p2134_p10 = pnand %p2132_p4, %p2607_p8 }
  0x3e   : > { %p2135_p11 = pneg %p2134_p10 }
  0x40   : > { %p2140_p13 = pnand %p2138_p12, %p2135_p11 }
  0x42   : > { %2143 = shalt.err (!%p2140_p13)
}
  0x43   : > { %s2144_s18 = scalar_lea.vmem %s2595_s22, 16  ;;  %s2151_s27 = scalar_lea.vmem %s2595_s22, 32 }
  0x44   : > { %p2145_p0 = scmp.ne.s32.totalorder %s2595_s22, %s2144_s18  ;;  %p2152_p7 = scmp.lt.s32.totalorder %s2595_s22, %s2595_s22 }
  0x45   : > { %p2153_p9 = scmp.lt.s32.totalorder %s2151_s27, %s2144_s18 }
  0x46   : > { %p2147_p2 = pnand %p2145_p0, %p2607_p8 }
  0x47   : > { %p2154_p4 = por %p2153_p9, %p2152_p7 }
  0x48   : > { %p2148_p5 = pneg %p2147_p2 }
  0x4a   : > { %p2155_p10 = pnand %p2154_p4, %p2148_p5 }
  0x4c   : > { %2158 = shalt.err (!%p2155_p10)
}
  0x4d   : > { %1964 = dma.hbm_to_vmem [thread:$0]  (!%p2591_p6), %s3151_s3, 16, %s2595_s22, [#allocation9]  }
  0x4e   : > { %s3152_s5 = sld [smem:[#allocation32_spill]] }
  0x54   : > { %s2159_s30 = scalar_lea.hbm %s3152_s5, 16 }
  0x55   : > { %p2160_p11 = scmp.ne.s32.totalorder %s3152_s5, %s2159_s30  ;;  %p2166_p0 = scmp.lt.u32.totalorder %s2159_s30, %s3152_s5 }
  0x57   : > { %p2162_p12 = pnand %p2160_p11, %p2607_p8 }
  0x59   : > { %p2163_p13 = pneg %p2162_p12 }
  0x5b   : > { %p2168_p2 = pnand %p2166_p0, %p2163_p13 }
  0x5d   : > { %2171 = shalt.err (!%p2168_p2)
}
  0x5e   : > { %s2172_s22 = scalar_lea.vmem %s2597_s25, 16  ;;  %s2179_s27 = scalar_lea.vmem %s2597_s25, 32 }
  0x5f   : > { %p2173_p5 = scmp.ne.s32.totalorder %s2597_s25, %s2172_s22  ;;  %p2180_p4 = scmp.lt.s32.totalorder %s2597_s25, %s2597_s25 }
  0x60   : > { %p2181_p10 = scmp.lt.s32.totalorder %s2179_s27, %s2172_s22 }
  0x61   : > { %p2175_p7 = pnand %p2173_p5, %p2607_p8 }
  0x62   : > { %p2182_p11 = por %p2181_p10, %p2180_p4 }
  0x63   : > { %p2176_p9 = pneg %p2175_p7 }
  0x65   : > { %p2183_p12 = pnand %p2182_p11, %p2176_p9 }
  0x67   : > { %2186 = shalt.err (!%p2183_p12)
}
  0x68   : > { %1970 = dma.hbm_to_vmem [thread:$0]  (!%p2591_p6), %s3152_s5, 16, %s2597_s25, [#allocation12]  }
  0x69   : > { %s2484_s28 = smov [#allocation14]   ;;  %s2485_s30 = smov [#allocation10]  }
  0x6a   : > { %s358_s29 = sshll.u32 %s2484_s28, 4  ;;  %s320_s12 = sshll.u32 %s2485_s30, 4  ;;  %s359_s29 = int_to_ptr.vmem [resolvable:$true] %s358_s29  ;;  %s321_s12 = int_to_ptr.vmem [resolvable:$true] %s320_s12 }
  0x6b   : > { %s2187_s18 = scalar_lea.hbm %s3128_s7, 16 }
  0x6c   : > { %p2188_p13 = scmp.ne.s32.totalorder %s3128_s7, %s2187_s18  ;;  %p2194_p5 = scmp.lt.u32.totalorder %s2187_s18, %s3128_s7 }
  0x6e   : > { %p2190_p0 = pnand %p2188_p13, %p2607_p8 }
  0x70   : > { %p2191_p2 = pneg %p2190_p0 }
  0x72   : > { %p2196_p7 = pnand %p2194_p5, %p2191_p2 }
  0x74   : > { %2199 = shalt.err (!%p2196_p7)
}
  0x75   : > { %s2200_s25 = scalar_lea.vmem %s359_s29, 16  ;;  %s2207_s20 = scalar_lea.vmem %s359_s29, 32 }
  0x76   : > { %p2201_p9 = scmp.ne.s32.totalorder %s359_s29, %s2200_s25  ;;  %p2208_p11 = scmp.lt.s32.totalorder %s359_s29, %s359_s29 }
  0x77   : > { %p2209_p12 = scmp.lt.s32.totalorder %s2207_s20, %s2200_s25 }
  0x78   : > { %p2203_p4 = pnand %p2201_p9, %p2607_p8 }
  0x79   : > { %p2210_p1 = por %p2209_p12, %p2208_p11 }
  0x7a   : > { %p2204_p10 = pneg %p2203_p4 }
  0x7c   : > { %p2211_p3 = pnand %p2210_p1, %p2204_p10 }
  0x7e   : > { %2214 = shalt.err (!%p2211_p3)
}
  0x7f   : > { %1976 = dma.hbm_to_vmem [thread:$0]  (!%p2591_p6), %s3128_s7, 16, %s359_s29, [#allocation15]  }
  0x80   : > { %s3153_s4 = sld [smem:[#allocation31_spill]] }
  0x86   : > { %s2215_s21 = scalar_lea.hbm %s3153_s4, 256 }
  0x87   : > { %p2216_p13 = scmp.ne.s32.totalorder %s3153_s4, %s2215_s21  ;;  %p2222_p3 = scmp.lt.u32.totalorder %s2215_s21, %s3153_s4 }
  0x89   : > { %p2218_p0 = pnand %p2216_p13, %p2607_p8 }
  0x8b   : > { %p2219_p1 = pneg %p2218_p0 }
  0x8d   : > { %p2224_p2 = pnand %p2222_p3, %p2219_p1 }
  0x8f   : > { %2227 = shalt.err (!%p2224_p2)
}
  0x90   : > { %s2228_s25 = scalar_lea.vmem %s321_s12, 256  ;;  %p2236_p4 = scmp.lt.s32.totalorder %s321_s12, %s321_s12 }
  0x91   : > { %p2229_p5 = scmp.ne.s32.totalorder %s321_s12, %s2228_s25  ;;  %p2237_p10 = scmp.lt.s32.totalorder %s2228_s25, %s2228_s25 }
  0x93   : > { %p2231_p7 = pnand %p2229_p5, %p2607_p8  ;;  %p2238_p11 = por %p2237_p10, %p2236_p4 }
  0x95   : > { %p2232_p9 = pneg %p2231_p7 }
  0x97   : > { %p2239_p12 = pnand %p2238_p11, %p2232_p9 }
  0x99   : > { %2242 = shalt.err (!%p2239_p12)
}
  0x9a   : > { %s3154_s29 = smov 64   ;;  %s2486_s30 = smov [#allocation13]  }
  0x9b   : > { %1967 = dma.hbm_to_vmem [thread:$0]  (!%p2591_p6), %s3153_s4, 256, %s321_s12, [#allocation9], %s3154_s29, %s3154_s29, %s2483_s26  }
  0x9c   : > { %s344_s24 = sshll.u32 %s2486_s30, 4  ;;  %s2487_s17 = smov [#allocation16]   ;;  %s345_s24 = int_to_ptr.vmem [resolvable:$true] %s344_s24 }
  0x9d   : > { %s368_s21 = sshll.u32 %s2487_s17, 4  ;;  %s3155_s6 = sld [smem:[#allocation33_spill]]  ;;  %s369_s21 = int_to_ptr.vmem [resolvable:$true] %s368_s21 }
  0xa3   : > { %s2243_s27 = scalar_lea.hbm %s3155_s6, 256 }
  0xa4   : > { %p2244_p13 = scmp.ne.s32.totalorder %s3155_s6, %s2243_s27  ;;  %p2250_p3 = scmp.lt.u32.totalorder %s2243_s27, %s3155_s6 }
  0xa6   : > { %p2246_p0 = pnand %p2244_p13, %p2607_p8 }
  0xa8   : > { %p2247_p1 = pneg %p2246_p0 }
  0xaa   : > { %p2252_p2 = pnand %p2250_p3, %p2247_p1 }
  0xac   : > { %2255 = shalt.err (!%p2252_p2)
}
  0xad   : > { %s2256_s12 = scalar_lea.vmem %s345_s24, 256  ;;  %p2264_p4 = scmp.lt.s32.totalorder %s345_s24, %s345_s24 }
  0xae   : > { %p2257_p5 = scmp.ne.s32.totalorder %s345_s24, %s2256_s12  ;;  %p2265_p10 = scmp.lt.s32.totalorder %s2256_s12, %s2256_s12 }
  0xb0   : > { %p2259_p7 = pnand %p2257_p5, %p2607_p8  ;;  %p2266_p11 = por %p2265_p10, %p2264_p4 }
  0xb2   : > { %p2260_p9 = pneg %p2259_p7 }
  0xb4   : > { %p2267_p12 = pnand %p2266_p11, %p2260_p9 }
  0xb6   : > { %2270 = shalt.err (!%p2267_p12)
}
  0xb7   : > { %1973 = dma.hbm_to_vmem [thread:$0]  (!%p2591_p6), %s3155_s6, 256, %s345_s24, [#allocation12], %s3154_s29, %s3154_s29, %s2483_s26  }
  0xb8   : > { %s2271_s18 = scalar_lea.hbm %s3129_s8, 1024 }
  0xb9   : > { %p2272_p13 = scmp.ne.s32.totalorder %s3129_s8, %s2271_s18  ;;  %p2278_p3 = scmp.lt.u32.totalorder %s2271_s18, %s3129_s8 }
  0xbb   : > { %p2274_p0 = pnand %p2272_p13, %p2607_p8 }
  0xbd   : > { %p2275_p1 = pneg %p2274_p0 }
  0xbf   : > { %p2280_p2 = pnand %p2278_p3, %p2275_p1 }
  0xc1   : > { %2283 = shalt.err (!%p2280_p2)
}
  0xc2   : > { %s2284_s20 = scalar_lea.vmem %s369_s21, 1024  ;;  %p2292_p4 = scmp.lt.s32.totalorder %s369_s21, %s369_s21 }
  0xc3   : > { %p2285_p5 = scmp.ne.s32.totalorder %s369_s21, %s2284_s20  ;;  %p2293_p10 = scmp.lt.s32.totalorder %s2284_s20, %s2284_s20 }
  0xc5   : > { %p2287_p7 = pnand %p2285_p5, %p2607_p8  ;;  %p2294_p11 = por %p2293_p10, %p2292_p4 }
  0xc7   : > { %p2288_p9 = pneg %p2287_p7 }
  0xc9   : > { %p2295_p12 = pnand %p2294_p11, %p2288_p9 }
  0xcb   : > { %2298 = shalt.err (!%p2295_p12)
}
  0xcc   : > { %1979 = dma.hbm_to_vmem [thread:$0]  (!%p2591_p6), %s3129_s8, 1024, %s369_s21, [#allocation15], %s3154_s29, %s3154_s29, %s2483_s26  }
  0xcd   : > { %s2488_s2 = smov [#allocation17]   ;;  %s2299_s18 = scalar_lea.hbm %s3130_s9, 16 }
  0xce   : > { %s382_s28 = sshll.u32 %s2488_s2, 4  ;;  %p2300_p13 = scmp.ne.s32.totalorder %s3130_s9, %s2299_s18  ;;  %s383_s28 = int_to_ptr.vmem [resolvable:$true] %s382_s28 }
  0xcf   : > { %p2306_p3 = scmp.lt.u32.totalorder %s2299_s18, %s3130_s9 }
  0xd0   : > { %p2302_p0 = pnand %p2300_p13, %p2607_p8 }
  0xd2   : > { %p2303_p1 = pneg %p2302_p0 }
  0xd4   : > { %p2308_p2 = pnand %p2306_p3, %p2303_p1 }
  0xd6   : > { %2311 = shalt.err (!%p2308_p2)
}
  0xd7   : > { %s2312_s26 = scalar_lea.vmem %s383_s28, 16  ;;  %s2319_s29 = scalar_lea.vmem %s383_s28, 32 }
  0xd8   : > { %p2313_p5 = scmp.ne.s32.totalorder %s383_s28, %s2312_s26  ;;  %p2320_p4 = scmp.lt.s32.totalorder %s383_s28, %s383_s28 }
  0xd9   : > { %p2321_p10 = scmp.lt.s32.totalorder %s2319_s29, %s2312_s26 }
  0xda   : > { %p2315_p7 = pnand %p2313_p5, %p2607_p8 }
  0xdb   : > { %p2322_p11 = por %p2321_p10, %p2320_p4 }
  0xdc   : > { %p2316_p9 = pneg %p2315_p7 }
  0xde   : > { %p2323_p12 = pnand %p2322_p11, %p2316_p9 }
  0xe0   : > { %2326 = shalt.err (!%p2323_p12)
}
  0xe1   : > { %1982 = dma.hbm_to_vmem [thread:$0]  (!%p2591_p6), %s3130_s9, 16, %s383_s28, [#allocation18]  }
  0xe2   : > { %s1712_s11 = sadd.s32 4294967294, %s2477_s16   ;;  %s2780_s23 = sadd.s32 1, %s2477_s16  }
  0xe3   : > { %s37_s24 = ssub.s32 %s2477_s16, %s2780_s23  ;;  %s40_s12 = sadd.s32 1, %s2473_s15 }
  0xe4   : > { %p38_p8 = scmp.eq.s32.totalorder %s37_s24, 0  ;;  %p47_p13 = scmp.ne.s32.totalorder %s2473_s15, %s2469_s14 }
  0xe5   : > { %p48_p0 = scmp.eq.s32.totalorder %s2477_s16, 0  ;;  %p53_p1 = scmp.ne.s32.totalorder %s2469_s14, %s2465_s13 }
  0xe6   : > { %s2791_s2 = scalar_select %p38_p8, %s2473_s15, %s40_s12  }
  0xe7   : > { %p2793_p3 = por %p48_p0, %p47_p13  ;;  %p3157_p2 = scmp.eq.s32.totalorder %s2575_s19, 0 }
  0xe8   : > { %p271_p5 = scmp.eq.s32.totalorder %s2575_s19, 1  ;;  %p277_p7 = scmp.eq.s32.totalorder %s1712_s11, 1 }
  0xe9   : > { %p2799_p6 = por %p3157_p2, %p53_p1  ;;  %p2002_p9 = scmp.lt.s32.totalorder %s2477_s16, 2 }
  0xea   : > { %s393_s17 = sand.u32 1, %s2473_s15   ;;  %p2806_p4 = por %p271_p5, %p47_p13 }
  0xeb   : > { %s3158_s28 = scalar_select %p2799_p6, 1, 0 }
  0xec   : > { %s3159_s18 = scalar_select %p2806_p4, 1, 0 }
  0xed   : > { %p2810_p10 = por %p277_p7, %p53_p1  ;;  %s2814_s27 = sshll.u32 %s393_s17, 3 }
  0xee   : > { %s1724_s10 = sshll.u32 %s2477_s16, 7  ;;  %s397_s21 = scalar_lea.vmem [#allocation2], %s2814_s27 }
  0xef   : > { %s3160_s22 = scalar_select %p2810_p10, 1, 0 }
  0xf0   : > { %s2820_s29 = scalar_lea.hbm %s3121_s0, %s1724_s10  ;;  %s404_s20 = sshll.u32 %s397_s21, 4  ;;  %s2823_s20 = int_to_ptr.vmem [resolvable:$true] %s404_s20 }
  0xf1   : > { %p2827_p11 = pnand %p2002_p9, %p2793_p3  ;;  %s2834_s25 = scalar_lea.hbm %s3122_s1, %s1724_s10 }
  0xf2   : > { %s411_s26 = sand.u32 1, %s2477_s16   ;;  %s394_s3 = scalar_lea.sflag [#allocation3], %s393_s17 }
  0xf3   : > { %s2327_s4 = scalar_lea.hbm %s2820_s29, 128  ;;  %p2329_p8 = pneg %p2827_p11 }
  0xf4   : > { %p2328_p12 = scmp.ne.s32.totalorder %s2820_s29, %s2327_s4  ;;  %s2332_s5 = scalar_lea.hbm %s3121_s0, 256 }
  0xf5   : > { %p2333_p1 = scmp.lt.u32.totalorder %s2820_s29, %s3121_s0  ;;  %p2334_p3 = scmp.lt.u32.totalorder %s2332_s5, %s2327_s4 }
  0xf6   : > { %p2330_p13 = pnand %p2329_p8, %p2328_p12  ;;  %p2336_p5 = scmp.lt.u32.totalorder %s2327_s4, %s2820_s29 }
  0xf7   : > { %p2335_p2 = por %p2334_p3, %p2333_p1 }
  0xf8   : > { %p2331_p0 = pneg %p2330_p13 }
  0xf9   : > { %p2337_p7 = por %p2336_p5, %p2335_p2 }
  0xfb   : > { %p2338_p9 = pnand %p2337_p7, %p2331_p0 }
  0xfd   : > { %2341 = shalt.err (!%p2338_p9)
}
  0xfe   : > { %s2342_s17 = scalar_lea.vmem %s2823_s20, 128  ;;  %s2489_s10 = smov [#allocation2]  }
  0xff   : > { %p2343_p12 = scmp.ne.s32.totalorder %s2823_s20, %s2342_s17  ;;  %s2347_s12 = sshll.u32 %s2489_s10, 4  ;;  %s2348_s12 = int_to_ptr.vmem [resolvable:$false] %s2347_s12 }
 0x100   : > { %s2349_s6 = scalar_lea.vmem %s2348_s12, 256  ;;  %p2350_p4 = scmp.lt.s32.totalorder %s2823_s20, %s2348_s12 }
 0x101   : > { %p2345_p13 = pnand %p2343_p12, %p2329_p8  ;;  %p2351_p1 = scmp.lt.s32.totalorder %s2349_s6, %s2342_s17 }
 0x103   : > { %p2346_p10 = pneg %p2345_p13  ;;  %p2352_p3 = por %p2351_p1, %p2350_p4 }
 0x105   : > { %p2353_p2 = pnand %p2352_p3, %p2346_p10 }
 0x107   : > { %2356 = shalt.err (!%p2353_p2)
}
 0x108   : > { %1986 = dma.hbm_to_vmem [thread:$0]  (!%p2827_p11), %s2820_s29, 128, %s2823_s20, %s394_s3  }
 0x109   : > { %s415_s4 = scalar_lea.vmem [#allocation5], %s2814_s27  ;;  %s412_s30 = scalar_lea.sflag [#allocation6], %s411_s26 }
 0x10a   : > { %s422_s5 = sshll.u32 %s415_s4, 4  ;;  %s2357_s21 = scalar_lea.hbm %s2834_s25, 128  ;;  %s423_s5 = int_to_ptr.vmem [resolvable:$true] %s422_s5 }
 0x10b   : > { %p2358_p4 = scmp.ne.s32.totalorder %s2834_s25, %s2357_s21  ;;  %s2362_s10 = scalar_lea.hbm %s3122_s1, 256 }
 0x10c   : > { %p2363_p5 = scmp.lt.u32.totalorder %s2834_s25, %s3122_s1  ;;  %p2364_p7 = scmp.lt.u32.totalorder %s2362_s10, %s2357_s21 }
 0x10d   : > { %p2360_p10 = pnand %p2358_p4, %p2329_p8  ;;  %p2366_p12 = scmp.lt.u32.totalorder %s2357_s21, %s2834_s25 }
 0x10e   : > { %p2365_p9 = por %p2364_p7, %p2363_p5 }
 0x10f   : > { %p2361_p0 = pneg %p2360_p10 }
 0x110   : > { %p2367_p13 = por %p2366_p12, %p2365_p9 }
 0x112   : > { %p2368_p1 = pnand %p2367_p13, %p2361_p0 }
 0x114   : > { %2371 = shalt.err (!%p2368_p1)
}
 0x115   : > { %s2372_s3 = scalar_lea.vmem %s423_s5, 128  ;;  %s2490_s27 = smov [#allocation5]  }
 0x116   : > { %p2373_p3 = scmp.ne.s32.totalorder %s423_s5, %s2372_s3  ;;  %s2377_s29 = sshll.u32 %s2490_s27, 4  ;;  %s2378_s29 = int_to_ptr.vmem [resolvable:$false] %s2377_s29 }
 0x117   : > { %s2379_s20 = scalar_lea.vmem %s2378_s29, 256  ;;  %p2380_p10 = scmp.lt.s32.totalorder %s423_s5, %s2378_s29 }
 0x118   : > { %p2375_p2 = pnand %p2373_p3, %p2329_p8  ;;  %p2381_p6 = scmp.lt.s32.totalorder %s2379_s20, %s2372_s3 }
 0x11a   : > { %p2376_p4 = pneg %p2375_p2  ;;  %p2382_p5 = por %p2381_p6, %p2380_p10 }
 0x11c   : > { %p2383_p7 = pnand %p2382_p5, %p2376_p4 }
 0x11e   : > { %2386 = shalt.err (!%p2383_p7)
}
 0x11f   : > { %1989 = dma.hbm_to_vmem [thread:$0]  (!%p2827_p11), %s2834_s25, 128, %s423_s5, %s412_s30  }
 0x120   : > { %s3162_s26 = sld [smem:[#allocation28_spill]] }
 0x126   : > { %p3163_p0 = scmp.ne.s32.totalorder %s3162_s26, 0 }
 0x127   : > { %s2887_s4 = sand.u32 (!%p3163_p0), 1, %s2469_s14   ;;  %p3164_p6 = scmp.ne.s32.totalorder (!%p3163_p0), %s3158_s28, 0 }
 0x128   : > { %431 = sbr.rel (%p3163_p0) target bundleno = 2704 (0xa90), region = 60  ;;  %s2890_s21 = sshll.u32 (!%p3163_p0), %s2887_s4, 3 }
 0x129   : > { %s434_s24 = scalar_lea.sflag (!%p3163_p0), [#allocation3], %s2887_s4  ;;  %s437_s17 = scalar_lea.vmem (!%p3163_p0), [#allocation2], %s2890_s21 }
 0x12f   : > { %2432 = dma.done.wait (%p3164_p6), %s434_s24, 128  }
 0x130   : > { %2434 = vsyncadd (%p3164_p6), %s434_s24, 4294967168  ;;  %s442_s11 = sand.u32 1, %s2575_s19   ;;  %s446_s5 = scalar_lea.vmem [#allocation5], %s2890_s21 }
 0x131   : > { %s443_s25 = scalar_lea.sflag [#allocation6], %s442_s11 }
 0x132   : > { %2436 = dma.done.wait (%p3164_p6), %s443_s25, 128  }
 0x133   : > { %2438 = vsyncadd (%p3164_p6), %s443_s25, 4294967168  ;;  %p3165_p11 = scmp.eq.s32.totalorder %s2575_s19, 0 }
 0x135   : > { %2440 = dma.done.wait (%p3165_p11), [#allocation6], 256   ;;  %p3166_p8 = pmov %p3165_p11 }
 0x137   : > { %2442 = vsyncadd (%p3166_p8), [#allocation6], 4294967040  ;;  %p3167_p9 = pmov %p3166_p8 }
 0x138   : > { %p3168_p12 = pmov %p3166_p8 }
 0x139   : > { %2444 = dma.done.wait (%p3167_p9), [#allocation9], 272  }
 0x13a   : > { %2446 = vsyncadd (%p3168_p12), [#allocation9], 4294967024  ;;  %p3169_p13 = pmov %p3166_p8 }
 0x13b   : > { %p3170_p1 = pmov %p3166_p8 }
 0x13c   : > { %2448 = dma.done.wait (%p3169_p13), [#allocation12], 272  }
 0x13d   : > { %2450 = vsyncadd (%p3170_p1), [#allocation12], 4294967024  ;;  %p3171_p3 = pmov %p3170_p1 }
 0x13e   : > { %p3172_p2 = pmov %p3170_p1 }
 0x13f   : > { %2452 = dma.done.wait (%p3171_p3), [#allocation15], 1040  }
 0x140   : > { %2454 = vsyncadd (%p3172_p2), [#allocation15], 4294966256  ;;  %p3173_p4 = pmov %p3170_p1 }
 0x141   : > { %p3174_p10 = pmov %p3170_p1 }
 0x142   : > { %2456 = dma.done.wait (%p3173_p4), [#allocation18], 16  }
 0x143   : > { %2458 = vsyncadd (%p3174_p10), [#allocation18], 4294967280  ;;  %vm523_vm0 = vcmask 261120   ;;  %v2924_v0 = vld [vmem:[%s437_s17] sm:$0xff]  ;;  %v2491_v8 = vmov 0.0   ;;  %vm2492_vm1 = vmmov 0   ;;  %v539_v12 = vlaneseq }
 0x144   : > { %v524_v1 = vsel %vm523_vm0, %v2924_v0, 0.0  ;;  %v2061_v7 = vld [vmem:[#allocation7] sm:$0xff]   ;;  %1812 = vmatprep.subr.bf16.mxu1 %v2491_v8  ;;  %1816 = vmatprep.mubr.msk.bf16.mxu1 %vm2492_vm1, %v2491_v8  ;;  %v2062_v9 = vld [vmem:[#allocation7 + $0x8] sm:$0xff]   ;;  %v2942_v15 = vld [vmem:[%s446_s5] sm:$0x3f]  ;;  %s2493_s28 = smov 104  }
 0x145   : > { %525 = vadd.xlane.f32.xlu0 %v524_v1  ;;  %1813 = vmatpush3.bf16.msra.mxu1 %v2061_v7  ;;  %v2938_v14 = vshrl.u32 %v539_v12, 7  ;;  %v2945_v16 = vadd.f32 1.0, %v2942_v15  ;;  %v1739_v26 = vld [vmem:[#allocation8] ss:$0 sm:$0xff]  ;;  %s2494_s30 = smov 120   ;;  %s2495_s10 = smov 112  }
 0x146   : > { %1838 = vmatprep.subr.bf16.mxu0 %v2491_v8  ;;  %1814 = vmatprep.subr.bf16.mxu1 %v2491_v8  ;;  %s2496_s12 = smov 96   ;;  %vm641_vm2 = vcmask 64512   ;;  %s2497_s6 = smov 64   ;;  %vm900_vm3 = vcmask 1043456  }
 0x147   : > { %1840 = vmatprep.mubr.msk.bf16.mxu0 %vm2492_vm1, %v2491_v8  ;;  %v541_v17 = vsub.s32 1, %v2938_v14  ;;  %v546_v18 = vsub.s32 0, %v2938_v14  ;;  %s1770_s3 = sshll.u32 %s2575_s19, 7  ;;  %s519_s27 = scalar_lea.vmem [#allocation19], %s2890_s21 }
 0x148   : > { %s1543_s29 = sshll.u32 %s519_s27, 4  ;;  %s3175_s24 = sld [smem:[#allocation34_spill]]  ;;  %s3078_s29 = int_to_ptr.vmem [resolvable:$true] %s1543_s29 }
 0x149   : > { %1815 = vmatpush3.bf16.msra.mxu1 %v2062_v9  ;;  %v542_v19 = vrot.slane %v2945_v16, %v541_v17  ;;  %v547_v22 = vrot.slane %v2942_v15, %v546_v18  ;;  %s1530_s11 = scalar_lea.sflag [#allocation4], %s2887_s4  ;;  %s2387_s19 = scalar_lea.vmem %s3078_s29, 128 }
 0x14a   : > { %1820 = vmatprep.subr.bf16.mxu1 %v2491_v8  ;;  %p2388_p5 = scmp.ne.s32.totalorder %s3078_s29, %s2387_s19  ;;  %p3176_p7 = scmp.ne.s32.totalorder %s3159_s18, 0 }
 0x14b   : > { %s2498_s21 = smov [#allocation19]  }
 0x14c   : > { %p2389_p0 = pnand %p2388_p5, %p3176_p7  ;;  %s2391_s25 = sshll.u32 %s2498_s21, 4  ;;  %s2392_s25 = int_to_ptr.vmem [resolvable:$false] %s2391_s25 }
 0x14d   : > { %s2393_s5 = scalar_lea.vmem %s2392_s25, 256  ;;  %p2394_p11 = scmp.lt.s32.totalorder %s3078_s29, %s2392_s25 }
 0x14e   : > { %s3076_s17 = scalar_lea.hbm %s3175_s24, %s1770_s3  ;;  %p2390_p6 = pneg %p2389_p0 }
 0x14f   : > { %p2395_p8 = scmp.lt.s32.totalorder %s2393_s5, %s2387_s19 }
 0x151   : > { %p2396_p9 = por %p2395_p8, %p2394_p11 }
 0x153   : > { %p2397_p12 = pnand %p2396_p9, %p2390_p6 }
 0x1d2   : > { %v526_v2 = vpop.xlane.xlu0 %525 }
 0x1d3   : > { %v528_v3 = vmul.f32 0.03125, %v526_v2 }
 0x1d5   : > { %v529_v4 = vsub.f32 %v2924_v0, %v528_v3 }
 0x1d7   : > { %v530_v5 = vmul.f32 %v529_v4, %v529_v4 }
 0x1d9   : > { %v531_v6 = vsel %vm523_vm0, %v530_v5, 0.0 }
 0x1da   : > { %532 = vadd.xlane.f32.xlu0 %v531_v6 }
 0x267   : > { %v533_v10 = vpop.xlane.xlu0 %532 }
 0x268   : > { %v534_v11 = vmul.f32 0.03125, %v533_v10 }
 0x26a   : > { %v535_v13 = vadd.f32 1e-06, %v534_v11 }
 0x26c   : > { %2073 = vrsqrt.f32 %v535_v13 }
 0x276   : > { %v2074_v20 = vpop.eup %2073 }
 0x277   : > { %v537_v21 = vmul.f32 %v2074_v20, %v529_v4 }
 0x279   : > { %v543_v23 = vmul.f32 %v542_v19, %v537_v21 }
 0x27b   : > { %v548_v24 = vadd.f32 %v547_v22, %v543_v23 }
 0x27d   : > { %v549_v25 = vpack.c.bf16 %v548_v24, %v548_v24 }
 0x27f   : > { %1817 = vmatmul.mubr.msk.bf16.vlgmr.msra.gmra.mrb[0].mxu1 %vm523_vm0, %v549_v25 }
 0x280   : > { %1822 = vmatprep.mubr.msk.bf16.mxu1 %vm2492_vm1, %v2491_v8 }
 0x352   : > { %v610_v27 = vpop.f32.mrb[0].mxu1 }
 0x353   : > { %v611_v28 = vadd.f32 %v1739_v26, %v610_v27  ;;  %v1818_v29 = vpop.f32.mrb[1].mxu1 }
 0x354   : > { %v613_v30 = vpop.f32.mrb[2].mxu1 }
 0x355   : > { %623 = vrot.lane.b32.xlu0 %v611_v28, %s2493_s28  ;;  %617 = vrot.lane.b32.xlu1 %v611_v28, %s2494_s30  ;;  %v1819_v31 = vpop.f32.mrb[3].mxu1  ;;  %v634_v32 = vpack.c.bf16 %v611_v28, %v611_v28  ;;  %v626_v41 = vmul.f32 0.35355338, %v611_v28 }
 0x357   : > { %v630_v42 = vpack.c.bf16 %v626_v41, %v626_v41 }
 0x359   : > { %620 = vrot.lane.b32.xlu1 %v611_v28, %s2495_s10 }
 0x35d   : > { %639 = vrot.lane.b32.xlu1 %v634_v32, %s2496_s12 }
 0x3c7   : > { %v618_v33 = vpop.permute.xlu1 %617  ;;  %v624_v37 = vpop.permute.xlu0 %623 }
 0x3c8   : > { %v2954_v34 = vpack.c.bf16 %v618_v33, %v618_v33  ;;  %v2957_v39 = vpack.c.bf16 %v624_v37, %v624_v37  ;;  %v627_v45 = vmul.f32 0.35355338, %v618_v33  ;;  %v629_v51 = vmul.f32 0.35355338, %v624_v37 }
 0x3ca   : > { %689 = vrot.lane.b32.xlu1 %v2954_v34, %s2496_s12  ;;  %v631_v47 = vpack.c.bf16 %v627_v45, %v627_v45  ;;  %v633_v54 = vpack.c.bf16 %v629_v51, %v629_v51 }
 0x3cb   : > { %v621_v35 = vpop.permute.xlu1 %620 }
 0x3cc   : > { %v636_v36 = vpack.c.bf16 %v621_v35, %v621_v35  ;;  %v628_v52 = vmul.f32 0.35355338, %v621_v35 }
 0x3ce   : > { %738 = vrot.lane.b32.xlu1 %v636_v36, %s2496_s12  ;;  %v632_v55 = vpack.c.bf16 %v628_v52, %v628_v52 }
 0x3cf   : > { %v640_v38 = vpop.permute.xlu1 %639 }
 0x3d0   : > { %v646_v40 = vsel %vm641_vm2, %v640_v38, 0 }
 0x3d1   : > { %1821 = vmatpush3.bf16.xpose.msra.mxu1 %v646_v40 }
 0x3d2   : > { %787 = vrot.lane.b32.xlu1 %v2957_v39, %s2496_s12  ;;  %1826 = vmatprep.subr.bf16.mxu1 %v2491_v8 }
 0x3d6   : > { %895 = vrot.lane.b32.xlu1 %v634_v32, %s2497_s6 }
 0x3d8   : > { %1823 = vmatmul.mubr.msk.bf16.vlgmr.msra.gmra.mrb[4].mxu1 %vm641_vm2, %v630_v42  ;;  %v1101_v42 = vld [vmem:[#allocation10] sm:$0xf] }
 0x3d9   : > { %1828 = vmatprep.mubr.msk.bf16.mxu1 %vm2492_vm1, %v2491_v8  ;;  %v1155_v45 = vsel %vm900_vm3, %v1101_v42, 0 }
 0x43c   : > { %v690_v43 = vpop.permute.xlu1 %689 }
 0x43d   : > { %v695_v44 = vsel %vm641_vm2, %v690_v43, 0 }
 0x43e   : > { %1827 = vmatpush3.bf16.xpose.msra.mxu1 %v695_v44 }
 0x43f   : > { %1832 = vmatprep.subr.bf16.mxu1 %v2491_v8 }
 0x440   : > { %v739_v46 = vpop.permute.xlu1 %738 }
 0x441   : > { %v744_v49 = vsel %vm641_vm2, %v739_v46, 0 }
 0x444   : > { %v788_v48 = vpop.permute.xlu1 %787 }
 0x445   : > { %1829 = vmatmul.mubr.msk.bf16.vlgmr.msra.gmra.mrb[8].mxu1 %vm641_vm2, %v631_v47  ;;  %v793_v50 = vsel %vm641_vm2, %v788_v48, 0 }
 0x446   : > { %1833 = vmatpush3.bf16.xpose.msra.mxu1 %v744_v49  ;;  %1839 = vmatpush3.bf16.xpose.msra.mxu0 %v793_v50 }
 0x447   : > { %1834 = vmatprep.mubr.msk.bf16.mxu1 %vm2492_vm1, %v2491_v8  ;;  %1844 = vmatprep.subr.bf16.mxu1 %v2491_v8 }
 0x448   : > { %1850 = vmatprep.subr.bf16.mxu0 %v2491_v8  ;;  %v896_v53 = vpop.permute.xlu1 %895 }
 0x449   : > { %v902_v56 = vsel %vm900_vm3, %v896_v53, 0 }
 0x44d   : > { %1835 = vmatmul.mubr.msk.bf16.vlgmr.msra.gmra.mrb[12].mxu1 %vm641_vm2, %v632_v55  ;;  %1841 = vmatmul.mubr.msk.bf16.vlgmr.msra.gmra.mrb[0].mxu0 %vm641_vm2, %v633_v54  ;;  %v1104_v54 = vld [vmem:[#allocation10 + $0x4] sm:$0xf] }
 0x44e   : > { %1845 = vmatpush3.bf16.msra.mxu1 %v902_v56  ;;  %1846 = vmatprep.mubr.msk.bf16.mxu1 %vm2492_vm1, %v2491_v8  ;;  %v1109_v56 = vsel %vm900_vm3, %v1104_v54, 0 }
 0x44f   : > { %1856 = vmatprep.subr.bf16.mxu1 %v2491_v8  ;;  %1852 = vmatprep.mubr.msk.bf16.mxu0 %vm2492_vm1, %v2491_v8 }
 0x4ab   : > { %v682_v57 = vpop.f32.mrb[4].mxu1 }
 0x4ac   : > { %v1824_v58 = vpop.f32.mrb[5].mxu1  ;;  %v835_v59 = vsel %vm641_vm2, %v682_v57, -inf }
 0x4ad   : > { %836 = vmax.xlane.f32.xlu1 %v835_v59  ;;  %v685_v60 = vpop.f32.mrb[6].mxu1 }
 0x4ae   : > { %v1825_v61 = vpop.f32.mrb[7].mxu1 }
 0x4be   : > { %992 = vrot.lane.b32.xlu1 %v636_v36, %s2497_s6 }
 0x518   : > { %v731_v62 = vpop.f32.mrb[8].mxu1 }
 0x519   : > { %v1830_v63 = vpop.f32.mrb[9].mxu1  ;;  %v838_v1 = vsel %vm641_vm2, %v731_v62, -inf }
 0x51a   : > { %839 = vmax.xlane.f32.xlu0 %v838_v1  ;;  %v734_v2 = vpop.f32.mrb[10].mxu1  ;;  %v1249_v63 = vld [vmem:[#allocation10 + $0xc] sm:$0xf] }
 0x51b   : > { %v1831_v3 = vpop.f32.mrb[11].mxu1 }
 0x520   : > { %v780_v4 = vpop.f32.mrb[12].mxu1  ;;  %v829_v5 = vpop.f32.mrb[0].mxu0 }
 0x521   : > { %v1836_v6 = vpop.f32.mrb[13].mxu1  ;;  %v1842_v7 = vpop.f32.mrb[1].mxu0  ;;  %v844_v9 = vsel %vm641_vm2, %v829_v5, -inf  ;;  %v841_v10 = vsel %vm641_vm2, %v780_v4, -inf }
 0x522   : > { %v832_v11 = vpop.f32.mrb[2].mxu0  ;;  %845 = vmax.xlane.f32.xlu0 %v844_v9  ;;  %842 = vmax.xlane.f32.xlu1 %v841_v10  ;;  %v783_v12 = vpop.f32.mrb[14].mxu1 }
 0x523   : > { %v1837_v13 = vpop.f32.mrb[15].mxu1  ;;  %v1843_v17 = vpop.f32.mrb[3].mxu0 }
 0x533   : > { %1040 = vrot.lane.b32.xlu1 %v2957_v39, %s2497_s6 }
 0x538   : > { %944 = vrot.lane.b32.xlu0 %v2954_v34, %s2497_s6 }
 0x53a   : > { %v837_v18 = vpop.xlane.xlu1 %836 }
 0x53b   : > { %v859_v19 = vsub.f32 %v682_v57, %v837_v18  ;;  %v847_v50 = vsub.f32 -inf, %v837_v18 }
 0x53d   : > { %v863_v20 = vmul.f32 1.442695, %v859_v19  ;;  %v851_v51 = vmul.f32 1.442695, %v847_v50 }
 0x53e   : > { %v993_v22 = vpop.permute.xlu1 %992 }
 0x53f   : > { %2075 = vpow2.f32 %v863_v20  ;;  %v998_v24 = vsel %vm900_vm3, %v993_v22, 0 }
 0x549   : > { %v2076_v21 = vpop.eup %2075 }
 0x54a   : > { %v891_v23 = vpack.c.bf16 %v2076_v21, %v2076_v21  ;;  %v875_v25 = vsel %vm641_vm2, %v2076_v21, 0.0 }
 0x54c   : > { %1847 = vmatmul.mubr.msk.bf16.vlgmr.msra.gmra.mrb[16].mxu1 %vm641_vm2, %v891_v23 }
 0x54d   : > { %1857 = vmatpush3.bf16.msra.mxu1 %v998_v24  ;;  %1858 = vmatprep.mubr.msk.bf16.mxu1 %vm2492_vm1, %v2491_v8 }
 0x54e   : > { %1868 = vmatprep.subr.bf16.mxu1 %v2491_v8 }
 0x557   : > { %876 = vadd.xlane.f32.xlu1 %v875_v25 }
 0x5a7   : > { %v2998_v26 = vpop.xlane.xlu0 %839 }
 0x5a8   : > { %v860_v27 = vsub.f32 %v731_v62, %v2998_v26 }
 0x5aa   : > { %v865_v28 = vmul.f32 1.442695, %v860_v27 }
 0x5ac   : > { %2077 = vpow2.f32 %v865_v28 }
 0x5af   : > { %v3001_v29 = vpop.xlane.xlu0 %845  ;;  %v3003_v30 = vpop.xlane.xlu1 %842 }
 0x5b0   : > { %v862_v31 = vsub.f32 %v829_v5, %v3001_v29  ;;  %v861_v32 = vsub.f32 %v780_v4, %v3003_v30  ;;  %v1254_v4 = vsel %vm900_vm3, %v1249_v63, 0  ;;  %v848_v5 = vsub.f32 -inf, %v2998_v26 }
 0x5b1   : > { %v850_v7 = vsub.f32 -inf, %v3001_v29  ;;  %v849_v9 = vsub.f32 -inf, %v3003_v30  ;;  %v1307_v63 = vsub.s32 2, %v2938_v14 }
 0x5b2   : > { %v869_v33 = vmul.f32 1.442695, %v862_v31  ;;  %v867_v34 = vmul.f32 1.442695, %v861_v32  ;;  %v853_v6 = vmul.f32 1.442695, %v848_v5 }
 0x5b3   : > { %v945_v35 = vpop.permute.xlu0 %944  ;;  %v1041_v38 = vpop.permute.xlu1 %1040  ;;  %v857_v10 = vmul.f32 1.442695, %v850_v7  ;;  %v855_v11 = vmul.f32 1.442695, %v849_v9  ;;  %v1199_v32 = vld [vmem:[#allocation10 + $0x8] sm:$0xf] }
 0x5b4   : > { %v950_v36 = vsel %vm900_vm3, %v945_v35, 0  ;;  %2079 = vpow2.f32 %v869_v33  ;;  %v1046_v41 = vsel %vm900_vm3, %v1041_v38, 0  ;;  %v1755_v7 = vld [vmem:[#allocation11] ss:$0 sm:$0xff] }
 0x5b5   : > { %1851 = vmatpush3.bf16.msra.mxu0 %v950_v36  ;;  %2081 = vpow2.f32 %v867_v34  ;;  %v1204_v36 = vsel %vm900_vm3, %v1199_v32, 0 }
 0x5b6   : > { %1862 = vmatprep.subr.bf16.mxu0 %v2491_v8  ;;  %v2078_v37 = vpop.eup %2077  ;;  %2083 = vpow2.f32 %v851_v51 }
 0x5b7   : > { %v878_v39 = vsel %vm641_vm2, %v2078_v37, 0.0  ;;  %v892_v40 = vpack.c.bf16 %v2078_v37, %v2078_v37 }
 0x5b8   : > { %879 = vadd.xlane.f32.xlu0 %v878_v39 }
 0x5b9   : > { %1853 = vmatmul.mubr.msk.bf16.vlgmr.msra.gmra.mrb[4].mxu0 %vm641_vm2, %v892_v40 }
 0x5ba   : > { %1863 = vmatpush3.bf16.msra.mxu0 %v1046_v41  ;;  %1864 = vmatprep.mubr.msk.bf16.mxu0 %vm2492_vm1, %v2491_v8 }
 0x5bb   : > { %1874 = vmatprep.subr.bf16.mxu0 %v2491_v8 }
 0x5be   : > { %v2080_v43 = vpop.eup %2079 }
 0x5bf   : > { %v894_v44 = vpack.c.bf16 %v2080_v43, %v2080_v43  ;;  %v2082_v46 = vpop.eup %2081  ;;  %v884_v49 = vsel %vm641_vm2, %v2080_v43, 0.0 }
 0x5c0   : > { %v881_v47 = vsel %vm641_vm2, %v2082_v46, 0.0  ;;  %v893_v48 = vpack.c.bf16 %v2082_v46, %v2082_v46  ;;  %v2084_v52 = vpop.eup %2083 }
 0x5c1   : > { %1865 = vmatmul.mubr.msk.bf16.vlgmr.msra.gmra.mrb[8].mxu0 %vm641_vm2, %v894_v44  ;;  %882 = vadd.xlane.f32.xlu0 %v881_v47  ;;  %v871_v55 = vmul.f32 0.0, %v2084_v52 }
 0x5c2   : > { %1875 = vmatpush3.bf16.msra.mxu0 %v1155_v45  ;;  %1859 = vmatmul.mubr.msk.bf16.vlgmr.msra.gmra.mrb[20].mxu1 %vm641_vm2, %v893_v48 }
 0x5c3   : > { %1876 = vmatprep.mubr.msk.bf16.mxu0 %vm2492_vm1, %v2491_v8  ;;  %1870 = vmatprep.mubr.msk.bf16.mxu1 %vm2492_vm1, %v2491_v8 }
 0x5c4   : > { %1886 = vmatprep.subr.bf16.mxu0 %v2491_v8  ;;  %1869 = vmatpush3.bf16.msra.mxu1 %v1109_v56 }
 0x5c5   : > { %885 = vadd.xlane.f32.xlu0 %v884_v49  ;;  %1880 = vmatprep.subr.bf16.mxu1 %v2491_v8 }
 0x5e4   : > { %v877_v53 = vpop.xlane.xlu1 %876 }
 0x5e5   : > { %v887_v57 = vadd.f32 %v877_v53, %v871_v55 }
 0x5e7   : > { %2085 = vrcp.f32 %v887_v57 }
 0x5e8   : > { %2087 = vpow2.f32 %v853_v6 }
 0x5e9   : > { %2089 = vpow2.f32 %v857_v10 }
 0x5ea   : > { %2091 = vpow2.f32 %v855_v11  ;;  %v1308_v11 = vrot.slane %v2942_v15, %v1307_v63 }
 0x5f1   : > { %v2086_v61 = vpop.eup %2085 }
 0x5f2   : > { %v2088_v12 = vpop.eup %2087 }
 0x5f3   : > { %v872_v17 = vmul.f32 0.0, %v2088_v12  ;;  %v2090_v20 = vpop.eup %2089 }
 0x5f4   : > { %v2092_v21 = vpop.eup %2091  ;;  %v874_v23 = vmul.f32 0.0, %v2090_v20 }
 0x5f5   : > { %v873_v24 = vmul.f32 0.0, %v2092_v21 }
 0x61f   : > { %v938_v58 = vpop.f32.mrb[16].mxu1 }
 0x620   : > { %v1088_v59 = vadd.f32 %v938_v58, %v871_v55  ;;  %v1848_v60 = vpop.f32.mrb[17].mxu1 }
 0x621   : > { %v941_v62 = vpop.f32.mrb[18].mxu1 }
 0x622   : > { %v1096_v1 = vmul.f32 %v2086_v61, %v1088_v59  ;;  %v1849_v2 = vpop.f32.mrb[19].mxu1 }
 0x624   : > { %v1100_v3 = vpack.c.bf16 %v1096_v1, %v1096_v1 }
 0x626   : > { %1877 = vmatmul.mubr.msk.bf16.vlgmr.msra.gmra.mrb[12].mxu0 %vm641_vm2, %v1100_v3 }
 0x627   : > { %1887 = vmatpush3.bf16.msra.mxu0 %v1254_v4  ;;  %1888 = vmatprep.mubr.msk.bf16.mxu0 %vm2492_vm1, %v2491_v8 }
 0x628   : > { %1900 = vmatprep.subr.bf16.mxu0 %v2491_v8 }
 0x645   : > { %v880_v13 = vpop.xlane.xlu0 %879 }
 0x646   : > { %v888_v19 = vadd.f32 %v880_v13, %v872_v17 }
 0x648   : > { %2093 = vrcp.f32 %v888_v19 }
 0x64e   : > { %v883_v18 = vpop.xlane.xlu0 %882 }
 0x64f   : > { %v889_v26 = vadd.f32 %v883_v18, %v873_v24 }
 0x652   : > { %v886_v22 = vpop.xlane.xlu0 %885  ;;  %v2094_v30 = vpop.eup %2093 }
 0x653   : > { %v890_v25 = vadd.f32 %v886_v22, %v874_v23 }
 0x655   : > { %2095 = vrcp.f32 %v890_v25  ;;  %v2063_v25 = vld [vmem:[#allocation13] sm:$0xff]  }
 0x656   : > { %2097 = vrcp.f32 %v889_v26  ;;  %v2064_v26 = vld [vmem:[#allocation13 + $0x8] sm:$0xff]  }
 0x65f   : > { %v2096_v40 = vpop.eup %2095 }
 0x660   : > { %v2098_v47 = vpop.eup %2097 }
 0x68c   : > { %v986_v27 = vpop.f32.mrb[4].mxu0 }
 0x68d   : > { %v1089_v28 = vadd.f32 %v986_v27, %v872_v17  ;;  %v1854_v29 = vpop.f32.mrb[5].mxu0 }
 0x68e   : > { %v989_v31 = vpop.f32.mrb[6].mxu0  ;;  %v1326_v29 = vsub.s32 4, %v2938_v14 }
 0x68f   : > { %v1097_v33 = vmul.f32 %v2094_v30, %v1089_v28  ;;  %v1855_v34 = vpop.f32.mrb[7].mxu0  ;;  %v1331_v30 = vsub.s32 3, %v2938_v14 }
 0x690   : > { %v1327_v31 = vrot.slane %v2945_v16, %v1326_v29  ;;  %v2068_v16 = vld [vmem:[#allocation16 + $0x18] sm:$0xff]  }
 0x691   : > { %v1102_v35 = vpack.c.bf16 %v1097_v33, %v1097_v33  ;;  %v1332_v34 = vrot.slane %v2942_v15, %v1331_v30 }
 0x693   : > { %1871 = vmatmul.mubr.msk.bf16.vlgmr.msra.gmra.mrb[24].mxu1 %vm641_vm2, %v1102_v35 }
 0x694   : > { %v1082_v37 = vpop.f32.mrb[8].mxu0  ;;  %1881 = vmatpush3.bf16.msra.mxu1 %v1204_v36  ;;  %1882 = vmatprep.mubr.msk.bf16.mxu1 %vm2492_vm1, %v2491_v8 }
 0x695   : > { %v1091_v38 = vadd.f32 %v1082_v37, %v874_v23  ;;  %v1866_v39 = vpop.f32.mrb[9].mxu0  ;;  %1892 = vmatprep.subr.bf16.mxu1 %v2491_v8  ;;  %v1034_v41 = vpop.f32.mrb[20].mxu1 }
 0x696   : > { %v1085_v42 = vpop.f32.mrb[10].mxu0  ;;  %v1090_v43 = vadd.f32 %v1034_v41, %v873_v24  ;;  %v1860_v45 = vpop.f32.mrb[21].mxu1  ;;  %v2066_v39 = vld [vmem:[#allocation16 + $0x8] sm:$0xff]   ;;  %v2069_v41 = vld [vmem:[#allocation16 + $0x20] sm:$0xff]  }
 0x697   : > { %v1099_v44 = vmul.f32 %v2096_v40, %v1091_v38  ;;  %v1867_v46 = vpop.f32.mrb[11].mxu0  ;;  %v1037_v48 = vpop.f32.mrb[22].mxu1  ;;  %v2065_v38 = vld [vmem:[#allocation16] sm:$0xff]   ;;  %v2067_v40 = vld [vmem:[#allocation16 + $0x10] sm:$0xff]   ;;  %v2070_v42 = vld [vmem:[#allocation16 + $0x28] sm:$0xff]  }
 0x698   : > { %v1098_v49 = vmul.f32 %v2098_v47, %v1090_v43  ;;  %v1861_v51 = vpop.f32.mrb[23].mxu1  ;;  %v2071_v43 = vld [vmem:[#allocation16 + $0x30] sm:$0xff]   ;;  %v1756_v45 = vld [vmem:[#allocation14] ss:$0 sm:$0xff] }
 0x699   : > { %v1247_v50 = vpack.c.bf16 %v1099_v44, %v1099_v44  ;;  %v2072_v44 = vld [vmem:[#allocation16 + $0x38] sm:$0xff]  }
 0x69a   : > { %v1197_v52 = vpack.c.bf16 %v1098_v49, %v1098_v49 }
 0x69b   : > { %1889 = vmatmul.mubr.msk.bf16.vlgmr.msra.gmra.mrb[16].mxu0 %vm641_vm2, %v1247_v50 }
 0x69c   : > { %1916 = vmatprep.mubr.msk.bf16.mxu0 %vm2492_vm1, %v2491_v8  ;;  %1883 = vmatmul.mubr.msk.bf16.vlgmr.msra.gmra.mrb[28].mxu1 %vm641_vm2, %v1197_v52 }
 0x69d   : > { %1896 = vmatprep.mubr.msk.bf16.mxu1 %vm2492_vm1, %v2491_v8  ;;  %1893 = vmatpush3.bf16.msra.mxu1 %v2063_v25 }
 0x69e   : > { %1894 = vmatprep.subr.bf16.mxu1 %v2491_v8  ;;  %1901 = vmatpush3.bf16.msra.mxu0 %v2065_v38 }
 0x69f   : > { %1902 = vmatprep.subr.bf16.mxu0 %v2491_v8 }
 0x6a1   : > { %1895 = vmatpush3.bf16.msra.mxu1 %v2064_v26 }
 0x6a2   : > { %1903 = vmatpush3.bf16.msra.mxu0 %v2066_v39 }
 0x6a3   : > { %1904 = vmatprep.subr.bf16.mxu0 %v2491_v8 }
 0x6a6   : > { %1905 = vmatpush3.bf16.msra.mxu0 %v2067_v40 }
 0x6a7   : > { %1906 = vmatprep.subr.bf16.mxu0 %v2491_v8 }
 0x6aa   : > { %1907 = vmatpush3.bf16.msra.mxu0 %v2068_v16 }
 0x6ab   : > { %1908 = vmatprep.subr.bf16.mxu0 %v2491_v8 }
 0x6ae   : > { %1909 = vmatpush3.bf16.msra.mxu0 %v2069_v41 }
 0x6af   : > { %1910 = vmatprep.subr.bf16.mxu0 %v2491_v8 }
 0x6b2   : > { %1911 = vmatpush3.bf16.msra.mxu0 %v2070_v42 }
 0x6b3   : > { %1912 = vmatprep.subr.bf16.mxu0 %v2491_v8 }
 0x6b6   : > { %1913 = vmatpush3.bf16.msra.mxu0 %v2071_v43 }
 0x6b7   : > { %1914 = vmatprep.subr.bf16.mxu0 %v2491_v8 }
 0x6ba   : > { %1915 = vmatpush3.bf16.msra.mxu0 %v2072_v44 }
 0x6f9   : > { %v1191_v53 = vpop.f32.mrb[12].mxu0 }
 0x6fa   : > { %v1878_v54 = vpop.f32.mrb[13].mxu0 }
 0x6fb   : > { %v1194_v55 = vpop.f32.mrb[14].mxu0 }
 0x6fc   : > { %v1879_v56 = vpop.f32.mrb[15].mxu0 }
 0x766   : > { %v1145_v57 = vpop.f32.mrb[24].mxu1 }
 0x767   : > { %v1192_v58 = vadd.f32 %v1191_v53, %v1145_v57  ;;  %v1872_v59 = vpop.f32.mrb[25].mxu1 }
 0x768   : > { %v1148_v60 = vpop.f32.mrb[26].mxu1 }
 0x769   : > { %v1873_v61 = vpop.f32.mrb[27].mxu1  ;;  %v1524_v60 = vsub.s32 5, %v2938_v14 }
 0x76a   : > { %v1760_v61 = vld [vmem:[#allocation17] ss:$0 sm:$0xff] }
 0x76e   : > { %v1290_v62 = vpop.f32.mrb[16].mxu0 }
 0x76f   : > { %v1890_v1 = vpop.f32.mrb[17].mxu0  ;;  %v1240_v2 = vpop.f32.mrb[28].mxu1 }
 0x770   : > { %v1293_v3 = vpop.f32.mrb[18].mxu0  ;;  %v1246_v4 = vadd.f32 %v1240_v2, %v1192_v58  ;;  %v1884_v5 = vpop.f32.mrb[29].mxu1 }
 0x771   : > { %v1891_v6 = vpop.f32.mrb[19].mxu0  ;;  %v1243_v9 = vpop.f32.mrb[30].mxu1 }
 0x772   : > { %v1296_v10 = vadd.f32 %v1290_v62, %v1246_v4  ;;  %v1885_v12 = vpop.f32.mrb[31].mxu1  ;;  %v1525_v62 = vrot.slane %v2942_v15, %v1524_v60 }
 0x774   : > { %v1304_v13 = vadd.f32 %v1755_v7, %v1296_v10 }
 0x776   : > { %v1309_v17 = vmul.f32 %v1308_v11, %v1304_v13 }
 0x778   : > { %v3049_v18 = vadd.f32 %v1309_v17, %v2924_v0 }
 0x77a   : > { %v1311_v19 = vsel %vm523_vm0, %v3049_v18, 0.0 }
 0x77b   : > { %1312 = vadd.xlane.f32.xlu1 %v1311_v19 }
 0x808   : > { %v1313_v20 = vpop.xlane.xlu1 %1312 }
 0x809   : > { %v1314_v21 = vmul.f32 0.03125, %v1313_v20 }
 0x80b   : > { %v1315_v22 = vsub.f32 %v3049_v18, %v1314_v21 }
 0x80d   : > { %v1316_v23 = vmul.f32 %v1315_v22, %v1315_v22 }
 0x80f   : > { %v1317_v24 = vsel %vm523_vm0, %v1316_v23, 0.0 }
 0x810   : > { %1318 = vadd.xlane.f32.xlu0 %v1317_v24 }
 0x89d   : > { %v1319_v0 = vpop.xlane.xlu0 %1318 }
 0x89e   : > { %v1320_v27 = vmul.f32 0.03125, %v1319_v0 }
 0x8a0   : > { %v1321_v28 = vadd.f32 1e-06, %v1320_v27 }
 0x8a2   : > { %2099 = vrsqrt.f32 %v1321_v28 }
 0x8ac   : > { %v2100_v32 = vpop.eup %2099 }
 0x8ad   : > { %v1323_v33 = vmul.f32 %v2100_v32, %v1315_v22 }
 0x8af   : > { %v1328_v35 = vmul.f32 %v1327_v31, %v1323_v33 }
 0x8b1   : > { %v1333_v36 = vadd.f32 %v1332_v34, %v1328_v35 }
 0x8b3   : > { %v1334_v37 = vpack.c.bf16 %v1333_v36, %v1333_v36 }
 0x8b5   : > { %1897 = vmatmul.mubr.msk.bf16.vlgmr.msra.gmra.mrb[32].mxu1 %vm523_vm0, %v1334_v37 }
 0x988   : > { %v1395_v46 = vpop.f32.mrb[32].mxu1 }
 0x989   : > { %v1396_v47 = vadd.f32 %v1756_v45, %v1395_v46  ;;  %v1898_v48 = vpop.f32.mrb[33].mxu1 }
 0x98a   : > { %v1398_v49 = vpop.f32.mrb[34].mxu1 }
 0x98b   : > { %v1401_v50 = vmul.f32 %v1396_v47, %v1396_v47  ;;  %v1899_v51 = vpop.f32.mrb[35].mxu1 }
 0x98d   : > { %v1402_v52 = vmul.f32 %v1401_v50, %v1396_v47 }
 0x98f   : > { %v1403_v53 = vmul.f32 0.044715, %v1402_v52 }
 0x991   : > { %v1404_v54 = vadd.f32 %v1403_v53, %v1396_v47 }
 0x993   : > { %v1405_v55 = vmul.f32 0.7978846, %v1404_v54 }
 0x995   : > { %2101 = vtanh.f32 %v1405_v55 }
 0x99f   : > { %v2102_v56 = vpop.eup %2101 }
 0x9a0   : > { %v1407_v57 = vadd.f32 1.0, %v2102_v56 }
 0x9a2   : > { %v1408_v58 = vmul.f32 0.5, %v1407_v57 }
 0x9a4   : > { %v1409_v59 = vmul.f32 %v1408_v58, %v1396_v47 }
 0x9a6   : > { %v1410_v8 = vpack.c.bf16 %v1409_v59, %v1409_v59 }
 0x9a8   : > { %1917 = vmatmul.mubr.bf16.vlgmr.msra.gmra.mrb[20].mxu0 %v1410_v8 }
 0xa7b   : > { %v1516_v63 = vpop.f32.mrb[20].mxu0 }
 0xa7c   : > { %v1517_v1 = vadd.f32 %v1760_v61, %v1516_v63  ;;  %v1918_v2 = vpop.f32.mrb[21].mxu0 }
 0xa7d   : > { %v1519_v3 = vpop.f32.mrb[22].mxu0 }
 0xa7e   : > { %v1526_v4 = vmul.f32 %v1525_v62, %v1517_v1  ;;  %v1919_v5 = vpop.f32.mrb[23].mxu0 }
 0xa80   : > { %v1527_v6 = vadd.f32 %v1526_v4, %v3049_v18 }
 0xa82   : > { %1528 = vst.msk [vmem:[%s519_s27] sm:$0xff] %vm523_vm0, %v1527_v6 }
 0xa83   : > { %2400 = shalt.err (!%p2397_p12)
}
 0xa84   : > { %s2401_s4 = scalar_lea.hbm %s3076_s17, 128  ;;  %s2405_s10 = scalar_lea.hbm %s3175_s24, 256 }
 0xa85   : > { %p2402_p13 = scmp.ne.s32.totalorder %s3076_s17, %s2401_s4  ;;  %p2406_p2 = scmp.lt.u32.totalorder %s3076_s17, %s3175_s24 }
 0xa86   : > { %p2407_p4 = scmp.lt.u32.totalorder %s2405_s10, %s2401_s4  ;;  %p2409_p5 = scmp.lt.u32.totalorder %s2401_s4, %s3076_s17 }
 0xa87   : > { %p2403_p1 = pnand %p2402_p13, %p3176_p7 }
 0xa88   : > { %p2408_p10 = por %p2407_p4, %p2406_p2 }
 0xa89   : > { %p2404_p3 = pneg %p2403_p1 }
 0xa8a   : > { %p2410_p0 = por %p2409_p5, %p2408_p10 }
 0xa8c   : > { %p2411_p6 = pnand %p2410_p0, %p2404_p3 }
 0xa8e   : > { %2414 = shalt.err (!%p2411_p6)
}
 0xa8f   : > { %1956 = dma.vmem_to_hbm [thread:$0]  (%p3176_p7), %s3078_s29, 128, %s3076_s17, %s1530_s11  }
 0xa90 PF: > { %s1555_s3 = sand.u32 1, %s2465_s13   ;;  %p3177_p11 = scmp.ne.s32.totalorder %s3160_s22, 0 }
 0xa91   : > { %p3178_p8 = scmp.ge.s32.totalorder %s2477_s16, 2  ;;  %s1556_s27 = scalar_lea.sflag [#allocation4], %s1555_s3 }
 0xa93   : > { %p1991_p9 = pnand %p3178_p8, %p3177_p11 }
 0xa95   : > { %2460 = dma.done.wait (!%p1991_p9), %s1556_s27, 128  }
 0xa96   : > { %2462 = vsyncadd (!%p1991_p9), %s1556_s27, 4294967168  ;;  %p30_p12 = scmp.ge.s32.totalorder %s2780_s23, 4   ;;  %s3179_s13 = smov %s2469_s14 }
 0xa97   : > { %s3180_s14 = smov %s2473_s15  ;;  %s3181_s15 = smov %s2791_s2 }
 0xa98   : > { %s3182_s16 = smov %s2780_s23  ;;  %32 = sbr.rel (!%p30_p12) target bundleno = 18 (0x12), region = 153 }
 0xa9f   :  { %1561 = vsyncpa [#allocation3], 1 }
 0xaa0   :  { %1563 = vsyncpa [#allocation3 + $0x1], 1 }
 0xaa1   :  { %1564 = vsyncpa [#allocation6], 1 }
 0xaa2   :  { %1566 = vsyncpa [#allocation6 + $0x1], 1 }
 0xaa3   :  { %1567 = vsyncpa [#allocation9], 1 }
 0xaa4   :  { %1568 = vsyncpa [#allocation12], 1 }
 0xaa5   :  { %1569 = vsyncpa [#allocation15], 1 }
 0xaa6   :  { %1570 = vsyncpa [#allocation18], 1 }
 0xaa7   :  { %1571 = vsyncpa [#allocation4], 1 }
 0xaa8   :  { %1573 = vsyncpa [#allocation4 + $0x1], 1 }

</bundles_post_ra>
